<compile_context>
chip_gen: v7x
topology: tpu7x:2x2x1
jax: 0.10.0
libtpu: 0.0.40
codegen_flags: <defaults>
</compile_context>

<pallas_src>
import functools

import numpy as np
import jax
import jax.numpy as jnp
from jax.experimental import pallas as pl
from jax.experimental.pallas import tpu as pltpu

F32 = jnp.float32
BF16 = jnp.bfloat16


def _round_up(x, m):
    return ((x + m - 1) // m) * m


def _pick_vmem_limit():
    # ~3/4 of physical VMEM, capped: v5e/v6e (128 MiB) -> 96 MB, v7x (64 MiB)
    # -> 48 MB.  All kernel working sets below are sized well under 48 MB.
    try:
        cap = pltpu.get_tpu_info().vmem_capacity_bytes
    except Exception:
        cap = 64 * 1024 * 1024
    return int(min(cap * 3 // 4, 100 * 1024 * 1024))


_VMEM_LIMIT = _pick_vmem_limit()


# ----------------------------- linear ------------------------------------

def _linear_kernel(x_ref, w_ref, b_ref, o_ref):
    x = x_ref[...].astype(BF16)                     # bf16 MXU operands
    acc = jnp.dot(x, w_ref[...], preferred_element_type=jnp.float32)
    o_ref[...] = (acc + b_ref[...]).astype(o_ref.dtype)


def linear(x, w, b, *, out_dtype=F32, tm_max=512):
    """x: (M, K), w: (K, N) bf16, b: (1, N) f32 -> (M, N) out_dtype.

    Tiled over (N, M); the N (weight) tile is the OUTER grid axis so each
    weight block is DMA'd once, not once per row tile.  Both axes parallel.
    """
    M, K = x.shape
    Kw, N = w.shape
    assert Kw == K and N % 128 == 0
    tn = next(t for t in (1024, 512, 256, 128) if N % t == 0)
    tm = min(tm_max, _round_up(M, 8))
    Mp = _round_up(M, tm)
    xp = jnp.pad(x, ((0, Mp - M), (0, 0))) if Mp != M else x

    out = pl.pallas_call(
        _linear_kernel,
        out_shape=jax.ShapeDtypeStruct((Mp, N), out_dtype),
        grid=(N // tn, Mp // tm),
        in_specs=[
            pl.BlockSpec((tm, K), lambda ni, mi: (mi, 0)),
            pl.BlockSpec((K, tn), lambda ni, mi: (0, ni)),
            pl.BlockSpec((1, tn), lambda ni, mi: (0, ni)),
        ],
        out_specs=pl.BlockSpec((tm, tn), lambda ni, mi: (mi, ni)),
        compiler_params=pltpu.CompilerParams(
            dimension_semantics=("parallel", "parallel"),
            vmem_limit_bytes=_VMEM_LIMIT),
    )(xp, w, b)
    return out[:M] if Mp != M else out


# ------------------------ conv1d('same') + maxpool ------------------------

def _conv1d_pool_kernel(x_ref, w_ref, b_ref, o_ref, *, T, K, pad, use_roll):
    # x_ref: (1, T [or T+K-1], Cin) bf16   w_ref: (K, Cin, Nt) bf16
    # b_ref: (1, Nt) f32                   o_ref: (1, T//2, Nt) bf16
    Nt = o_ref.shape[-1]
    x = x_ref[0]
    acc = jnp.zeros((T, Nt), jnp.float32)
    if use_roll:
        # Per-tap matmul on the un-shifted (aligned) x; the time shift is
        # applied to the (T, Nt) result via an XLU roll + edge mask instead of
        # sublane-misaligned slices of the (T, Cin) slab.
        row = jax.lax.broadcasted_iota(jnp.int32, (T, 1), 0)
        for k in range(K):
            yk = jnp.dot(x, w_ref[k], preferred_element_type=jnp.float32)
            shift = pad - k
            if shift != 0:
                yk = pltpu.roll(yk, shift=shift % T, axis=0)
                src = row - shift            # source time index feeding row t
                yk = jnp.where((src >= 0) & (src < T), yk, 0.0)
            acc = acc + yk
    else:
        # fallback path (wrapper-padded halo, static tap slices)
        for k in range(K):
            acc = acc + jnp.dot(x[k:k + T, :], w_ref[k],
                                preferred_element_type=jnp.float32)
    acc = acc + b_ref[...]
    Th = T // 2
    o_ref[0] = jnp.max(acc[:2 * Th].reshape(Th, 2, Nt), axis=1).astype(o_ref.dtype)


def _conv_pool_call(xin, w, b, *, T, K, pad, use_roll, n_tile):
    B, t_in, Cin = xin.shape
    Cout = w.shape[2]
    Th = T // 2
    kernel = functools.partial(_conv1d_pool_kernel, T=T, K=K, pad=pad,
                               use_roll=use_roll)
    return pl.pallas_call(
        kernel,
        out_shape=jax.ShapeDtypeStruct((B, Th, Cout), BF16),
        grid=(Cout // n_tile, B),            # weight tile on the OUTER axis
        in_specs=[
            pl.BlockSpec((1, t_in, Cin), lambda ni, bi: (bi, 0, 0)),
            pl.BlockSpec((K, Cin, n_tile), lambda ni, bi: (0, 0, ni)),
            pl.BlockSpec((1, n_tile), lambda ni, bi: (0, ni)),
        ],
        out_specs=pl.BlockSpec((1, Th, n_tile), lambda ni, bi: (bi, 0, ni)),
        compiler_params=pltpu.CompilerParams(
            dimension_semantics=("parallel", "parallel"),
            vmem_limit_bytes=_VMEM_LIMIT),
    )(xin, w, b)


def conv1d_maxpool(x, w, b, *, n_tile=512):
    """Conv1d('same', k) fused with MaxPool1d(2): (B,T,Cin)->(B,T//2,Cout)."""
    B, T, Cin = x.shape
    K, _, Cout = w.shape
    assert Cout % n_tile == 0
    pad = (K - 1) // 2
    if T % 8 == 0 and T >= 8:
        # Halo handled in-kernel: no wrapper jnp.pad HBM round trip.
        try:
            out = _conv_pool_call(x, w, b, T=T, K=K, pad=pad, use_roll=True,
                                  n_tile=n_tile)
            jax.block_until_ready(out)
            return out
        except Exception:
            pass  # conservative fallback if sublane roll is unsupported
    xin = jnp.pad(x, ((0, 0), (pad, K - 1 - pad), (0, 0)))
    return _conv_pool_call(xin, w, b, T=T, K=K, pad=pad, use_roll=False,
                           n_tile=n_tile)


# -------------------------- fused BiLSTM layer -----------------------------

def _bilstm_layer_kernel(x_ref, wih_ref, whh_ref, b_ref, len_ref, o_ref,
                         h_ref, c_ref, xg_ref, *, TC, NC):
    # grid = (direction, time-chunk).  Gate order matches torch.nn.LSTM: i,f,g,o.
    # x_ref  : (B, TC, IN) bf16 chunk      wih_ref: (1, IN, 4H) bf16 (resident)
    # whh_ref: (1, H, 4H) f32 (resident)   b_ref  : (1, 1, 4H) f32
    # len_ref: (B, 1) int32 sequence lengths (packed-seq masking)
    # o_ref  : (B, TC, H) bf16 chunk of the concatenated (B, T, 2H) output
    # h_ref/c_ref: (B, H) f32 state carried across chunks; xg_ref: (B, TC, 4H)
    d = pl.program_id(0)
    ci = pl.program_id(1)

    @pl.when(ci == 0)
    def _():
        h_ref[...] = jnp.zeros_like(h_ref)
        c_ref[...] = jnp.zeros_like(c_ref)

    B = x_ref.shape[0]
    H = h_ref.shape[-1]
    is_bwd = d == 1
    # backward direction consumes chunks (and rows within a chunk) in reverse
    chunk = (1 - d) * ci + d * (NC - 1 - ci)
    t0 = chunk * TC

    # Fused input projection for the whole chunk (bf16 MXU, f32 accumulate),
    # hoisted out of the per-timestep recurrence; staged in VMEM scratch.
    wih = wih_ref[0]
    for bi in range(B):
        xg_ref[bi] = jnp.dot(x_ref[bi], wih, preferred_element_type=jnp.float32)

    whh = whh_ref[0]
    bias = b_ref[0]                      # (1, 4H)
    lens = len_ref[...]                  # (B, 1) int32
    h_st = h_ref[...]
    c_st = c_ref[...]

    outs = [None] * TC
    for j in range(TC):                  # static unroll over the time chunk
        jr = TC - 1 - j
        gx = jnp.where(is_bwd, xg_ref[:, jr, :], xg_ref[:, j, :])   # (B, 4H)
        t_abs = t0 + jnp.where(is_bwd, jr, j)
        valid = t_abs < lens                                         # (B, 1)
        gates = gx + bias + jnp.dot(h_st, whh,
                                    preferred_element_type=jnp.float32)
        ig = jax.nn.sigmoid(gates[:, 0 * H:1 * H])
        fg = jax.nn.sigmoid(gates[:, 1 * H:2 * H])
        gg = jnp.tanh(gates[:, 2 * H:3 * H])
        og = jax.nn.sigmoid(gates[:, 3 * H:4 * H])
        c_new = fg * c_st + ig * gg
        h_new = og * jnp.tanh(c_new)
        h_st = jnp.where(valid, h_new, h_st)         # packed-seq: no update
        c_st = jnp.where(valid, c_new, c_st)
        outs[j] = jnp.where(valid, h_new, 0.0)       # padded positions -> 0

    h_ref[...] = h_st
    c_ref[...] = c_st
    # time-aligned store of the whole chunk (dense HBM writeback per block)
    for r in range(TC):
        o_ref[:, r, :] = jnp.where(is_bwd, outs[TC - 1 - r],
                                   outs[r]).astype(o_ref.dtype)


def _bilstm_layer(x, lens2d, layer, *, tc=16):
    """One bidirectional LSTM layer.  x: (B, T, IN) bf16 -> (B, T, 2H) bf16."""
    B, T, IN = x.shape
    H4 = layer["whh"].shape[-1]
    H = H4 // 4
    if T <= tc:
        TC, Tp = T, T
    else:
        TC = tc                                   # multiple of 8
        Tp = _round_up(T, TC)
    NC = Tp // TC
    xp = jnp.pad(x, ((0, 0), (0, Tp - T), (0, 0))) if Tp != T else x

    def chunk_idx(d, ci):                          # reversed chunk order for d=1
        return (1 - d) * ci + d * (NC - 1 - ci)

    kernel = functools.partial(_bilstm_layer_kernel, TC=TC, NC=NC)
    out = pl.pallas_call(
        kernel,
        out_shape=jax.ShapeDtypeStruct((B, Tp, 2 * H), BF16),
        grid=(2, NC),
        in_specs=[
            pl.BlockSpec((B, TC, IN), lambda d, ci: (0, chunk_idx(d, ci), 0)),
            pl.BlockSpec((1, IN, H4), lambda d, ci: (d, 0, 0)),
            pl.BlockSpec((1, H, H4), lambda d, ci: (d, 0, 0)),
            pl.BlockSpec((1, 1, H4), lambda d, ci: (d, 0, 0)),
            pl.BlockSpec((B, 1), lambda d, ci: (0, 0)),
        ],
        out_specs=pl.BlockSpec((B, TC, H),
                               lambda d, ci: (0, chunk_idx(d, ci), d)),
        scratch_shapes=[pltpu.VMEM((B, H), F32),       # h
                        pltpu.VMEM((B, H), F32),       # c
                        pltpu.VMEM((B, TC, H4), F32)], # chunk gate projection
        compiler_params=pltpu.CompilerParams(
            dimension_semantics=("parallel", "arbitrary"),
            vmem_limit_bytes=_VMEM_LIMIT),
    )(xp, layer["wih"], layer["whh"], layer["b"], lens2d)
    return out[:, :T, :] if Tp != T else out


def blstm_encoder(x, lengths, layers, *, tc=16):
    """2-layer bidirectional LSTM (hidden 512/direction), packed-seq
    semantics: outputs at padded positions are zero."""
    B = x.shape[0]
    lens2d = lengths.reshape(B, 1).astype(jnp.int32)
    h = x
    for layer in layers:
        h = _bilstm_layer(h, lens2d, layer, tc=tc)
    return h


# ----------------------------- model pieces -------------------------------

def backbone_features(video, w, b):
    # TODO(synk): the real GoogLeNet CNN backbone is not reproduced; stand-in
    # is flatten(NCHW frame) -> Pallas linear projection to 1024-d features.
    N = video.shape[0]
    x = video.reshape(N, -1)
    return linear(x, w, b, out_dtype=BF16)                       # (N, 1024)


def cma_forward(video, len_video, params):
    """video: (sum(len_video), 3, H, W) NCHW; len_video: list of python ints."""
    feats = backbone_features(video, params["backbone"]["w"],
                              params["backbone"]["b"])           # (N, 1024) bf16

    # split + pad_sequence(batch_first=True)
    lens = [int(l) for l in len_video]
    T = max(lens)
    segs, off = [], 0
    for L in lens:
        seg = feats[off:off + L]
        segs.append(jnp.pad(seg, ((0, T - L), (0, 0))))
        off += L
    x = jnp.stack(segs, axis=0)                                  # (B, T, 1024)

    # tcn_block: [Conv1d(1024,1024,5,pad=2) -> MaxPool(2)] x 2, pool fused
    x = conv1d_maxpool(x, params["conv1"]["w"], params["conv1"]["b"])
    x = conv1d_maxpool(x, params["conv2"]["w"], params["conv2"]["b"])

    new_len = jnp.asarray(lens, jnp.int32) // 4

    x = blstm_encoder(x, new_len, params["blstm"])               # (B, T//4, 1024)

    Bt, Tt, C = x.shape
    logits = linear(x.reshape(Bt * Tt, C), params["gloss"]["wt"],
                    params["gloss"]["b"], out_dtype=F32)         # padded vocab
    logits = logits.reshape(Bt, Tt, -1)[..., :params["gloss"]["voc"]]
    return logits, new_len, None, None


# ----------------------------- parameter init -----------------------------

def init_params(key, *, in_hw=(16, 16), gls_voc_size=1233):
    Hh, Ww = in_hw
    keys = iter(jax.random.split(key, 64))

    def dense(k, shape, fan_in, dtype=BF16):
        return (jax.random.normal(k, shape, F32) / np.sqrt(fan_in)).astype(dtype)

    params = {}
    din = 3 * Hh * Ww
    params["backbone"] = {"w": dense(next(keys), (din, 1024), din),
                          "b": jnp.zeros((1, 1024), F32)}
    for name in ("conv1", "conv2"):
        # stored as (K, Cin, Cout) bf16 for channels-last conv
        params[name] = {"w": dense(next(keys), (5, 1024, 1024), 5 * 1024),
                        "b": jnp.zeros((1, 1024), F32)}

    hidden = 512
    blstm = []
    for _layer in range(2):
        in_size = 1024  # layer 0: features; layer 1: bi-directional concat
        wih = jnp.stack([dense(next(keys), (in_size, 4 * hidden), in_size),
                         dense(next(keys), (in_size, 4 * hidden), in_size)],
                        axis=0)                                  # (2, in, 4H) bf16
        whh = jnp.stack([dense(next(keys), (hidden, 4 * hidden), hidden, F32),
                         dense(next(keys), (hidden, 4 * hidden), hidden, F32)],
                        axis=0)                                  # (2, H, 4H) f32
        b = jnp.stack([dense(next(keys), (1, 4 * hidden), hidden, F32),
                       dense(next(keys), (1, 4 * hidden), hidden, F32)],
                      axis=0)                                    # (2, 1, 4H) f32
        blstm.append({"wih": wih, "whh": whh, "b": b})
    params["blstm"] = blstm

    # gloss output layer; vocabulary padded to a multiple of 512 (1233 -> 1536)
    # so the output tile is a lane-dense 512; padded columns sliced off after.
    voc_pad = _round_up(gls_voc_size, 512)
    wt = dense(next(keys), (1024, gls_voc_size), 1024)
    wt = jnp.pad(wt, ((0, 0), (0, voc_pad - gls_voc_size)))
    params["gloss"] = {"wt": wt,
                       "b": jnp.zeros((1, voc_pad), F32),
                       "voc": gls_voc_size}
    return params


# --------------------------------- main ------------------------------------

if __name__ == "__main__":
    key = jax.random.PRNGKey(0)
    k_params, k_video = jax.random.split(key)

    gls_voc_size = 1233
    H = W = 16
    len_video = [8, 6]                       # two clips; padded T = 8, T//4 = 2
    n_frames = sum(len_video)

    video = jax.random.normal(k_video, (n_frames, 3, H, W), F32)  # NCHW frames
    params = init_params(k_params, in_hw=(H, W), gls_voc_size=gls_voc_size)

    logits, new_len, _, _ = cma_forward(video, len_video, params)
    jax.block_until_ready(logits)
    jax.block_until_ready(new_len)

    assert logits.shape == (2, 2, gls_voc_size)
    assert bool(jnp.all(jnp.isfinite(logits)))
    print("KERNEL_OK")
</pallas_src>

<mosaic_0001>
module attributes {stable_mosaic.version = 11 : i64} {
  func.func @_linear_kernel(%arg0: i32, %arg1: i32, %arg2: memref<16x768xf32, #tpu.memory_space<vmem>>, %arg3: memref<768x1024xbf16, #tpu.memory_space<vmem>>, %arg4: memref<1x1024xf32, #tpu.memory_space<vmem>>, %arg5: memref<16x1024xbf16, #tpu.memory_space<vmem>>) attributes {dimension_semantics = [#tpu.dimension_semantics<parallel>, #tpu.dimension_semantics<parallel>], iteration_bounds = array<i64: 1, 1>, scalar_prefetch = 0 : i64, scratch_operands = 0 : i64, tpu.core_type = #tpu.core_type<tc>, window_params = [{transform_indices = @transform_0, window_bounds = array<i64: 16, 768>}, {transform_indices = @transform_1, window_bounds = array<i64: 768, 1024>}, {transform_indices = @transform_2, window_bounds = array<i64: 1, 1024>}, {transform_indices = @transform_3, window_bounds = array<i64: 16, 1024>}]} {
    %c0 = arith.constant 0 : index
    %c0_0 = arith.constant 0 : index
    %0 = vector.load %arg2[%c0, %c0_0] : memref<16x768xf32, #tpu.memory_space<vmem>>, vector<16x768xf32>
    %1 = arith.truncf %0 : vector<16x768xf32> to vector<16x768xbf16>
    %c0_1 = arith.constant 0 : index
    %c0_2 = arith.constant 0 : index
    %2 = vector.load %arg3[%c0_1, %c0_2] : memref<768x1024xbf16, #tpu.memory_space<vmem>>, vector<768x1024xbf16>
    %cst = arith.constant dense<0.000000e+00> : vector<16x1024xf32>
    %3 = tpu.matmul %1, %2, %cst {dimension_numbers = #tpu.dot_dimension_numbers<[1], [0], [0], [1], [0, 0, 1, 1], [], []>} : vector<16x768xbf16>, vector<768x1024xbf16>, vector<16x1024xf32> -> vector<16x1024xf32>
    %c0_3 = arith.constant 0 : index
    %c0_4 = arith.constant 0 : index
    %4 = vector.load %arg4[%c0_3, %c0_4] : memref<1x1024xf32, #tpu.memory_space<vmem>>, vector<1x1024xf32>
    %5 = vector.broadcast %4 : vector<1x1024xf32> to vector<16x1024xf32>
    %6 = arith.addf %3, %5 : vector<16x1024xf32>
    %7 = arith.truncf %6 : vector<16x1024xf32> to vector<16x1024xbf16>
    %c0_5 = arith.constant 0 : index
    %c0_6 = arith.constant 0 : index
    %8 = vector.load %arg5[%c0_5, %c0_6] : memref<16x1024xbf16, #tpu.memory_space<vmem>>, vector<16x1024xbf16>
    tpu.vector_store %arg5[%c0_5, %c0_6], %7 {strides = array<i32>} : memref<16x1024xbf16, #tpu.memory_space<vmem>>, vector<16x1024xbf16>,
    return
  }
  func.func @transform_0(%arg0: i32, %arg1: i32) -> (i32, i32) {
    %c0_i32 = arith.constant 0 : i32
    %c0_i32_0 = arith.constant 0 : i32
    return %arg1, %c0_i32 : i32, i32
  }
  func.func @transform_1(%arg0: i32, %arg1: i32) -> (i32, i32) {
    %c0_i32 = arith.constant 0 : i32
    %c0_i32_0 = arith.constant 0 : i32
    return %c0_i32, %arg0 : i32, i32
  }
  func.func @transform_2(%arg0: i32, %arg1: i32) -> (i32, i32) {
    %c0_i32 = arith.constant 0 : i32
    %c0_i32_0 = arith.constant 0 : i32
    return %c0_i32, %arg0 : i32, i32
  }
  func.func @transform_3(%arg0: i32, %arg1: i32) -> (i32, i32) {
    %c0_i32 = arith.constant 0 : i32
    return %arg1, %arg0 : i32, i32
  }
}

</mosaic_0001>

<bundles_post_ra>
// kernel: tpu_custom_call.1
= control target key start
LH: loop header
LB: loop body
LE: loop exit
PB: predicated region body
PF: predicated region fallthrough
CT: control target
= control target key end

     0   :  { %8 = vsyncpa [#allocation3], 0  ;;  %s3676_s0 = inlined_call_operand.hbm [shape: f32[16,768], index: 0, kind: input, shape index: {}]   ;;  %s3677_s1 = inlined_call_operand.hbm [shape: bf16[768,1024], index: 1, kind: input, shape index: {}]   ;;  %s3678_s2 = inlined_call_operand.hbm [shape: f32[1,1024], index: 2, kind: input, shape index: {}]   ;;  %s3679_s3 = inlined_call_operand.hbm [shape: bf16[16,1024], index: 3, kind: output, shape index: {}]  }
   0x1   :  { %9 = vsyncpa [#allocation6], 0 }
   0x2   :  { %10 = vsyncpa [#allocation4], 0  ;;  %s3558_s12 = smov [#allocation5]   ;;  %s3464_s16 = scalar_lea.hbm %s3677_s1, 49152 }
   0x3   :  { %s28_s13 = sshll.u32 %s3558_s12, 4  ;;  %p3465_p0 = scmp.ne.s32.totalorder %s3677_s1, %s3464_s16  ;;  %s29_s13 = int_to_ptr.vmem [resolvable:$true] %s28_s13 }
   0x4   :  { %p3468_p1 = scmp.lt.u32.totalorder %s3464_s16, %s3677_s1 }
   0x6   :  { %p3470_p2 = pnand %p3468_p1, %p3465_p0 }
   0x8   :  { %3473 = shalt.err (!%p3470_p2)
}
   0x9   :  { %s3474_s21 = scalar_lea.vmem %s29_s13, 49152  ;;  %p3479_p4 = scmp.lt.s32.totalorder %s29_s13, %s29_s13 }
   0xa   :  { %p3475_p3 = scmp.ne.s32.totalorder %s29_s13, %s3474_s21  ;;  %p3480_p5 = scmp.lt.s32.totalorder %s3474_s21, %s3474_s21 }
   0xc   :  { %p3481_p6 = por %p3480_p5, %p3479_p4 }
   0xe   :  { %p3482_p7 = pnand %p3481_p6, %p3475_p3 }
  0x10   :  { %3485 = shalt.err (!%p3482_p7)
}
  0x11   :  { %s3559_s22 = smov 512   ;;  %s3560_s23 = smov 32  }
  0x12   :  { %34 = dma.hbm_to_vmem [thread:$0]  %s3677_s1, 49152, %s29_s13, [#allocation6], %s3559_s22, %s3559_s22, %s3560_s23  }
  0x13   :  { %s3561_s26 = smov [#allocation2]   ;;  %s3486_s30 = scalar_lea.hbm %s3676_s0, 1536 }
  0x14   :  { %s16_s27 = sshll.u32 %s3561_s26, 4  ;;  %p3487_p8 = scmp.ne.s32.totalorder %s3676_s0, %s3486_s30  ;;  %s17_s27 = int_to_ptr.vmem [resolvable:$true] %s16_s27 }
  0x15   :  { %p3490_p9 = scmp.lt.u32.totalorder %s3486_s30, %s3676_s0 }
  0x17   :  { %p3492_p10 = pnand %p3490_p9, %p3487_p8 }
  0x19   :  { %3495 = shalt.err (!%p3492_p10)
}
  0x1a   :  { %s3496_s8 = scalar_lea.vmem %s17_s27, 1536  ;;  %p3501_p12 = scmp.lt.s32.totalorder %s17_s27, %s17_s27 }
  0x1b   :  { %p3497_p11 = scmp.ne.s32.totalorder %s17_s27, %s3496_s8  ;;  %p3502_p13 = scmp.lt.s32.totalorder %s3496_s8, %s3496_s8 }
  0x1d   :  { %p3503_p0 = por %p3502_p13, %p3501_p12 }
  0x1f   :  { %p3504_p1 = pnand %p3503_p0, %p3497_p11 }
  0x21   :  { %3507 = shalt.err (!%p3504_p1)
}
  0x22   :  { %s3562_s1 = smov 768   ;;  %s3563_s9 = smov 48  }
  0x23   :  { %22 = dma.hbm_to_vmem [thread:$0]  %s3676_s0, 1536, %s17_s27, [#allocation3], %s3562_s1, %s3562_s1, %s3563_s9  }
  0x24   :  { %s3564_s12 = smov [#allocation7]   ;;  %s3508_s16 = scalar_lea.hbm %s3678_s2, 128 }
  0x25   :  { %s41_s13 = sshll.u32 %s3564_s12, 4  ;;  %p3509_p2 = scmp.ne.s32.totalorder %s3678_s2, %s3508_s16  ;;  %s42_s13 = int_to_ptr.vmem [resolvable:$true] %s41_s13 }
  0x26   :  { %p3512_p3 = scmp.lt.u32.totalorder %s3508_s16, %s3678_s2 }
  0x28   :  { %p3514_p4 = pnand %p3512_p3, %p3509_p2 }
  0x2a   :  { %3517 = shalt.err (!%p3514_p4)
}
  0x2b   :  { %s3518_s21 = scalar_lea.vmem %s42_s13, 128  ;;  %p3523_p6 = scmp.lt.s32.totalorder %s42_s13, %s42_s13 }
  0x2c   :  { %p3519_p5 = scmp.ne.s32.totalorder %s42_s13, %s3518_s21  ;;  %p3524_p7 = scmp.lt.s32.totalorder %s3518_s21, %s3518_s21 }
  0x2e   :  { %p3525_p8 = por %p3524_p7, %p3523_p6 }
  0x30   :  { %p3526_p9 = pnand %p3525_p8, %p3519_p5 }
  0x32   :  { %3529 = shalt.err (!%p3526_p9)
}
  0x33   :  { %44 = dma.hbm_to_vmem [thread:$0]  %s3678_s2, 128, %s42_s13, [#allocation6]  }
  0x34   :  { %3552 = dma.done.wait [#allocation3], 1536  }
  0x35   :  { %3553 = vsyncadd [#allocation3], 4294965760 }
  0x36   :  { %3554 = dma.done.wait [#allocation6], 49280  }
  0x37   :  { %3555 = vsyncadd [#allocation6], 4294918016  ;;  %v72_v0 = vld [vmem:[#allocation5] sm:$0xff]  ;;  %v73_v2 = vld [vmem:[#allocation5 + $0x8] sm:$0xff]  ;;  %s3565_s2 = smov [#allocation8]  }
  0x38   :  { %v76_v1 = vld [vmem:[#allocation5 + $0x20] sm:$0xff]  ;;  %v77_v4 = vld [vmem:[#allocation5 + $0x28] sm:$0xff]  ;;  %v61_v54 = vld [vmem:[#allocation2 + $0x38] sm:$0xff]  ;;  %s2995_s25 = sshll.u32 %s3565_s2, 4  ;;  %s2996_s25 = int_to_ptr.vmem [resolvable:$true] %s2995_s25 }
  0x39   :  { %v3009_v3 = vcombine.high %v72_v0, %v76_v1  ;;  %v3008_v5 = vcombine.low %v72_v0, %v76_v1  ;;  %v80_v6 = vld [vmem:[#allocation5 + $0x40] sm:$0xff]  ;;  %v3011_v8 = vcombine.high %v73_v2, %v77_v4  ;;  %v3010_v9 = vcombine.low %v73_v2, %v77_v4  ;;  %v81_v11 = vld [vmem:[#allocation5 + $0x48] sm:$0xff]  ;;  %s3530_s26 = scalar_lea.vmem %s2996_s25, 1024  ;;  %p3535_p11 = scmp.lt.s32.totalorder %s2996_s25, %s2996_s25 }
  0x3a   :  { %v84_v7 = vld [vmem:[#allocation5 + $0x60] sm:$0xff]  ;;  %v85_v12 = vld [vmem:[#allocation5 + $0x68] sm:$0xff]  ;;  %p3531_p10 = scmp.ne.s32.totalorder %s2996_s25, %s3530_s26  ;;  %p3536_p12 = scmp.lt.s32.totalorder %s3530_s26, %s3530_s26 }
  0x3b   :  { %v3017_v10 = vcombine.high %v80_v6, %v84_v7  ;;  %v88_v13 = vld [vmem:[#allocation5 + $0x80] sm:$0xff]  ;;  %2418 = vmatprep.subr.bf16.mxu0 %v3009_v3  ;;  %v3019_v14 = vcombine.high %v81_v11, %v85_v12  ;;  %v89_v16 = vld [vmem:[#allocation5 + $0x88] sm:$0xff]  ;;  %2547 = vmatprep.subr.bf16.mxu1 %v3011_v8  ;;  %v3016_v18 = vcombine.low %v80_v6, %v84_v7 }
  0x3c   :  { %v92_v15 = vld [vmem:[#allocation5 + $0xa0] sm:$0xff]  ;;  %v93_v17 = vld [vmem:[#allocation5 + $0xa8] sm:$0xff]  ;;  %2419 = vmatpush1.bf16.msra.mxu0 %v3008_v5  ;;  %2548 = vmatpush1.bf16.msra.mxu1 %v3010_v9  ;;  %v3018_v19 = vcombine.low %v81_v11, %v85_v12  ;;  %p3537_p13 = por %p3536_p12, %p3535_p11 }
  0x3d   :  { %2420 = vmatprep.subr.bf16.mxu0 %v3017_v10  ;;  %v3025_v20 = vcombine.high %v88_v13, %v92_v15  ;;  %2549 = vmatprep.subr.bf16.mxu1 %v3019_v14  ;;  %v3027_v21 = vcombine.high %v89_v16, %v93_v17  ;;  %v96_v22 = vld [vmem:[#allocation5 + $0xc0] sm:$0xff]  ;;  %v97_v24 = vld [vmem:[#allocation5 + $0xc8] sm:$0xff]  ;;  %v3024_v26 = vcombine.low %v88_v13, %v92_v15 }
  0x3e   :  { %v100_v23 = vld [vmem:[#allocation5 + $0xe0] sm:$0xff]  ;;  %v101_v25 = vld [vmem:[#allocation5 + $0xe8] sm:$0xff]  ;;  %v3026_v27 = vcombine.low %v89_v16, %v93_v17  ;;  %p3538_p0 = pnand %p3537_p13, %p3531_p10 }
  0x3f   :  { %v3033_v28 = vcombine.high %v96_v22, %v100_v23  ;;  %v3035_v29 = vcombine.high %v97_v24, %v101_v25  ;;  %v104_v30 = vld [vmem:[#allocation5 + $0x100] sm:$0xff]  ;;  %v105_v32 = vld [vmem:[#allocation5 + $0x108] sm:$0xff]  ;;  %v3032_v34 = vcombine.low %v96_v22, %v100_v23  ;;  %v3034_v35 = vcombine.low %v97_v24, %v101_v25 }
  0x40   :  { %2421 = vmatpush1.bf16.msra.mxu0 %v3016_v18  ;;  %2550 = vmatpush1.bf16.msra.mxu1 %v3018_v19  ;;  %v108_v31 = vld [vmem:[#allocation5 + $0x120] sm:$0xff]  ;;  %v109_v33 = vld [vmem:[#allocation5 + $0x128] sm:$0xff] }
  0x41   :  { %2422 = vmatprep.subr.bf16.mxu0 %v3025_v20  ;;  %2551 = vmatprep.subr.bf16.mxu1 %v3027_v21  ;;  %v3041_v36 = vcombine.high %v104_v30, %v108_v31  ;;  %v3043_v37 = vcombine.high %v105_v32, %v109_v33  ;;  %v112_v38 = vld [vmem:[#allocation5 + $0x140] sm:$0xff]  ;;  %v113_v40 = vld [vmem:[#allocation5 + $0x148] sm:$0xff]  ;;  %v3040_v42 = vcombine.low %v104_v30, %v108_v31 }
  0x42   :  { %v116_v39 = vld [vmem:[#allocation5 + $0x160] sm:$0xff]  ;;  %v117_v41 = vld [vmem:[#allocation5 + $0x168] sm:$0xff]  ;;  %v3042_v43 = vcombine.low %v105_v32, %v109_v33 }
  0x43   :  { %v3049_v44 = vcombine.high %v112_v38, %v116_v39  ;;  %v3051_v45 = vcombine.high %v113_v40, %v117_v41  ;;  %v120_v46 = vld [vmem:[#allocation5 + $0x180] sm:$0xff]  ;;  %v121_v48 = vld [vmem:[#allocation5 + $0x188] sm:$0xff]  ;;  %v3048_v50 = vcombine.low %v112_v38, %v116_v39  ;;  %v3050_v51 = vcombine.low %v113_v40, %v117_v41 }
  0x44   :  { %2423 = vmatpush1.bf16.msra.mxu0 %v3024_v26  ;;  %2552 = vmatpush1.bf16.msra.mxu1 %v3026_v27  ;;  %v124_v47 = vld [vmem:[#allocation5 + $0x1a0] sm:$0xff]  ;;  %v125_v49 = vld [vmem:[#allocation5 + $0x1a8] sm:$0xff] }
  0x45   :  { %2424 = vmatprep.subr.bf16.mxu0 %v3033_v28  ;;  %2553 = vmatprep.subr.bf16.mxu1 %v3035_v29  ;;  %v3057_v52 = vcombine.high %v120_v46, %v124_v47  ;;  %v55_v53 = vld [vmem:[#allocation2 + $0x8] sm:$0xff]  ;;  %v3059_v55 = vcombine.high %v121_v48, %v125_v49  ;;  %v128_v56 = vld [vmem:[#allocation5 + $0x1c0] sm:$0xff]  ;;  %v3056_v61 = vcombine.low %v120_v46, %v124_v47 }
  0x46   :  { %v132_v57 = vld [vmem:[#allocation5 + $0x1e0] sm:$0xff]  ;;  %v3625_v58 = vpack.c.bf16 %v61_v54, %v55_v53  ;;  %v129_v59 = vld [vmem:[#allocation5 + $0x1c8] sm:$0xff]  ;;  %v3058_v62 = vcombine.low %v121_v48, %v125_v49 }
  0x47   :  { %v133_v60 = vld [vmem:[#allocation5 + $0x1e8] sm:$0xff]  ;;  %v3065_v63 = vcombine.high %v128_v56, %v132_v57  ;;  %v136_v1 = vld [vmem:[#allocation5 + $0x200] sm:$0xff]  ;;  %v3064_v5 = vcombine.low %v128_v56, %v132_v57 }
  0x48   :  { %2425 = vmatpush1.bf16.msra.mxu0 %v3032_v34  ;;  %2554 = vmatpush1.bf16.msra.mxu1 %v3034_v35  ;;  %v3067_v0 = vcombine.high %v129_v59, %v133_v60  ;;  %v140_v2 = vld [vmem:[#allocation5 + $0x220] sm:$0xff]  ;;  %v137_v3 = vld [vmem:[#allocation5 + $0x208] sm:$0xff]  ;;  %v3066_v6 = vcombine.low %v129_v59, %v133_v60 }
  0x49   :  { %2426 = vmatprep.subr.bf16.mxu0 %v3041_v36  ;;  %2555 = vmatprep.subr.bf16.mxu1 %v3043_v37  ;;  %v141_v4 = vld [vmem:[#allocation5 + $0x228] sm:$0xff]  ;;  %v3073_v7 = vcombine.high %v136_v1, %v140_v2  ;;  %v144_v9 = vld [vmem:[#allocation5 + $0x240] sm:$0xff]  ;;  %v3072_v13 = vcombine.low %v136_v1, %v140_v2 }
  0x4a   :  { %2450 = vmatprep.mubr.bf16.mxu0 %v3625_v58  ;;  %2579 = vmatprep.mubr.bf16.mxu1 %v3625_v58  ;;  %v3075_v8 = vcombine.high %v137_v3, %v141_v4  ;;  %v148_v10 = vld [vmem:[#allocation5 + $0x260] sm:$0xff]  ;;  %v145_v11 = vld [vmem:[#allocation5 + $0x248] sm:$0xff]  ;;  %v3074_v14 = vcombine.low %v137_v3, %v141_v4 }
  0x4b   :  { %v149_v12 = vld [vmem:[#allocation5 + $0x268] sm:$0xff]  ;;  %v3081_v15 = vcombine.high %v144_v9, %v148_v10  ;;  %v152_v17 = vld [vmem:[#allocation5 + $0x280] sm:$0xff]  ;;  %v3080_v21 = vcombine.low %v144_v9, %v148_v10 }
  0x4c   :  { %2427 = vmatpush1.bf16.msra.mxu0 %v3040_v42  ;;  %2556 = vmatpush1.bf16.msra.mxu1 %v3042_v43  ;;  %v3083_v16 = vcombine.high %v145_v11, %v149_v12  ;;  %v156_v18 = vld [vmem:[#allocation5 + $0x2a0] sm:$0xff]  ;;  %v153_v19 = vld [vmem:[#allocation5 + $0x288] sm:$0xff]  ;;  %v3082_v22 = vcombine.low %v145_v11, %v149_v12 }
  0x4d   :  { %2428 = vmatprep.subr.bf16.mxu0 %v3049_v44  ;;  %2557 = vmatprep.subr.bf16.mxu1 %v3051_v45  ;;  %v157_v20 = vld [vmem:[#allocation5 + $0x2a8] sm:$0xff]  ;;  %v3089_v23 = vcombine.high %v152_v17, %v156_v18  ;;  %v160_v25 = vld [vmem:[#allocation5 + $0x2c0] sm:$0xff]  ;;  %v3088_v29 = vcombine.low %v152_v17, %v156_v18  ;;  %v57_v17 = vld [vmem:[#allocation2 + $0x18] sm:$0xff] }
  0x4e   :  { %v3091_v24 = vcombine.high %v153_v19, %v157_v20  ;;  %v164_v26 = vld [vmem:[#allocation5 + $0x2e0] sm:$0xff]  ;;  %v161_v27 = vld [vmem:[#allocation5 + $0x2c8] sm:$0xff]  ;;  %v3090_v30 = vcombine.low %v153_v19, %v157_v20 }
  0x4f   :  { %v165_v28 = vld [vmem:[#allocation5 + $0x2e8] sm:$0xff]  ;;  %v3097_v31 = vcombine.high %v160_v25, %v164_v26  ;;  %v168_v33 = vld [vmem:[#allocation5 + $0x300] sm:$0xff]  ;;  %v3096_v37 = vcombine.low %v160_v25, %v164_v26 }
  0x50   :  { %2429 = vmatpush1.bf16.msra.mxu0 %v3048_v50  ;;  %2558 = vmatpush1.bf16.msra.mxu1 %v3050_v51  ;;  %v3099_v32 = vcombine.high %v161_v27, %v165_v28  ;;  %v172_v34 = vld [vmem:[#allocation5 + $0x320] sm:$0xff]  ;;  %v169_v35 = vld [vmem:[#allocation5 + $0x308] sm:$0xff]  ;;  %v3098_v38 = vcombine.low %v161_v27, %v165_v28 }
  0x51   :  { %2430 = vmatprep.subr.bf16.mxu0 %v3057_v52  ;;  %2559 = vmatprep.subr.bf16.mxu1 %v3059_v55  ;;  %v173_v36 = vld [vmem:[#allocation5 + $0x328] sm:$0xff]  ;;  %v3105_v39 = vcombine.high %v168_v33, %v172_v34  ;;  %v176_v41 = vld [vmem:[#allocation5 + $0x340] sm:$0xff]  ;;  %v3104_v45 = vcombine.low %v168_v33, %v172_v34 }
  0x52   :  { %v3107_v40 = vcombine.high %v169_v35, %v173_v36  ;;  %v180_v42 = vld [vmem:[#allocation5 + $0x360] sm:$0xff]  ;;  %v177_v43 = vld [vmem:[#allocation5 + $0x348] sm:$0xff]  ;;  %v3106_v46 = vcombine.low %v169_v35, %v173_v36 }
  0x53   :  { %v181_v44 = vld [vmem:[#allocation5 + $0x368] sm:$0xff]  ;;  %v3113_v47 = vcombine.high %v176_v41, %v180_v42  ;;  %v184_v49 = vld [vmem:[#allocation5 + $0x380] sm:$0xff]  ;;  %v3112_v53 = vcombine.low %v176_v41, %v180_v42 }
  0x54   :  { %2431 = vmatpush1.bf16.msra.mxu0 %v3056_v61  ;;  %2560 = vmatpush1.bf16.msra.mxu1 %v3058_v62  ;;  %v3115_v48 = vcombine.high %v177_v43, %v181_v44  ;;  %v188_v50 = vld [vmem:[#allocation5 + $0x3a0] sm:$0xff]  ;;  %v185_v51 = vld [vmem:[#allocation5 + $0x388] sm:$0xff]  ;;  %v3114_v54 = vcombine.low %v177_v43, %v181_v44 }
  0x55   :  { %2432 = vmatprep.subr.bf16.mxu0 %v3065_v63  ;;  %2561 = vmatprep.subr.bf16.mxu1 %v3067_v0  ;;  %v189_v52 = vld [vmem:[#allocation5 + $0x3a8] sm:$0xff]  ;;  %v3121_v55 = vcombine.high %v184_v49, %v188_v50  ;;  %v192_v57 = vld [vmem:[#allocation5 + $0x3c0] sm:$0xff]  ;;  %v3120_v62 = vcombine.low %v184_v49, %v188_v50 }
  0x56   :  { %v3123_v56 = vcombine.high %v185_v51, %v189_v52  ;;  %v196_v59 = vld [vmem:[#allocation5 + $0x3e0] sm:$0xff]  ;;  %v193_v60 = vld [vmem:[#allocation5 + $0x3c8] sm:$0xff]  ;;  %v3122_v63 = vcombine.low %v185_v51, %v189_v52 }
  0x57   :  { %v197_v61 = vld [vmem:[#allocation5 + $0x3e8] sm:$0xff]  ;;  %v3129_v0 = vcombine.high %v192_v57, %v196_v59  ;;  %v200_v2 = vld [vmem:[#allocation5 + $0x400] sm:$0xff] }
  0x58   :  { %2433 = vmatpush1.bf16.msra.mxu0 %v3064_v5  ;;  %2562 = vmatpush1.bf16.msra.mxu1 %v3066_v6  ;;  %v3131_v1 = vcombine.high %v193_v60, %v197_v61  ;;  %v204_v3 = vld [vmem:[#allocation5 + $0x420] sm:$0xff]  ;;  %v201_v4 = vld [vmem:[#allocation5 + $0x408] sm:$0xff]  ;;  %v3128_v6 = vcombine.low %v192_v57, %v196_v59  ;;  %v3130_v9 = vcombine.low %v193_v60, %v197_v61 }
  0x59   :  { %2434 = vmatprep.subr.bf16.mxu0 %v3073_v7  ;;  %2563 = vmatprep.subr.bf16.mxu1 %v3075_v8  ;;  %v205_v5 = vld [vmem:[#allocation5 + $0x428] sm:$0xff]  ;;  %v54_v7 = vld [vmem:[#allocation2] sm:$0xff]  ;;  %v60_v8 = vld [vmem:[#allocation2 + $0x30] sm:$0xff]  ;;  %v3137_v10 = vcombine.high %v200_v2, %v204_v3  ;;  %v3136_v19 = vcombine.low %v200_v2, %v204_v3 }
  0x5a   :  { %v3139_v11 = vcombine.high %v201_v4, %v205_v5  ;;  %v208_v12 = vld [vmem:[#allocation5 + $0x440] sm:$0xff]  ;;  %v63_v18 = vld [vmem:[#allocation2 + $0x48] sm:$0xff]  ;;  %v3138_v20 = vcombine.low %v201_v4, %v205_v5 }
  0x5b   :  { %v3631_v25 = vpack.c.bf16 %v63_v18, %v57_v17  ;;  %v217_v26 = vld [vmem:[#allocation5 + $0x488] sm:$0xff]  ;;  %v228_v33 = vld [vmem:[#allocation5 + $0x4e0] sm:$0xff] }
  0x5c   :  { %2435 = vmatpush1.bf16.msra.mxu0 %v3072_v13  ;;  %2564 = vmatpush1.bf16.msra.mxu1 %v3074_v14  ;;  %v212_v13 = vld [vmem:[#allocation5 + $0x460] sm:$0xff]  ;;  %v209_v14 = vld [vmem:[#allocation5 + $0x448] sm:$0xff] }
  0x5d   :  { %2436 = vmatprep.subr.bf16.mxu0 %v3081_v15  ;;  %2565 = vmatprep.subr.bf16.mxu1 %v3083_v16  ;;  %v3629_v15 = vpack.c.bf16 %v60_v8, %v54_v7  ;;  %v213_v16 = vld [vmem:[#allocation5 + $0x468] sm:$0xff]  ;;  %v3144_v28 = vcombine.low %v208_v12, %v212_v13  ;;  %v236_v41 = vld [vmem:[#allocation5 + $0x520] sm:$0xff] }
  0x5e   :  { %v221_v27 = vld [vmem:[#allocation5 + $0x4a8] sm:$0xff]  ;;  %v244_v49 = vld [vmem:[#allocation5 + $0x560] sm:$0xff] }
  0x5f   :  { %v225_v34 = vld [vmem:[#allocation5 + $0x4c8] sm:$0xff]  ;;  %v252_v57 = vld [vmem:[#allocation5 + $0x5a0] sm:$0xff] }
  0x60   :  { %2437 = vmatpush1.bf16.msra.mxu0 %v3080_v21  ;;  %2566 = vmatpush1.bf16.msra.mxu1 %v3082_v22  ;;  %v3145_v21 = vcombine.high %v208_v12, %v212_v13  ;;  %v3147_v22 = vcombine.high %v209_v14, %v213_v16  ;;  %v229_v35 = vld [vmem:[#allocation5 + $0x4e8] sm:$0xff]  ;;  %v260_v2 = vld [vmem:[#allocation5 + $0x5e0] sm:$0xff] }
  0x61   :  { %2438 = vmatprep.subr.bf16.mxu0 %v3089_v23  ;;  %2567 = vmatprep.subr.bf16.mxu1 %v3091_v24  ;;  %v216_v23 = vld [vmem:[#allocation5 + $0x480] sm:$0xff]  ;;  %v233_v42 = vld [vmem:[#allocation5 + $0x508] sm:$0xff] }
  0x62   :  { %v220_v24 = vld [vmem:[#allocation5 + $0x4a0] sm:$0xff]  ;;  %v237_v43 = vld [vmem:[#allocation5 + $0x528] sm:$0xff] }
  0x63   :  { %v3152_v36 = vcombine.low %v216_v23, %v220_v24  ;;  %v241_v50 = vld [vmem:[#allocation5 + $0x548] sm:$0xff]  ;;  %v272_v18 = vld [vmem:[#allocation5 + $0x640] sm:$0xff] }
  0x64   :  { %2439 = vmatpush1.bf16.msra.mxu0 %v3088_v29  ;;  %2568 = vmatpush1.bf16.msra.mxu1 %v3090_v30  ;;  %v3146_v29 = vcombine.low %v209_v14, %v213_v16  ;;  %v3153_v30 = vcombine.high %v216_v23, %v220_v24  ;;  %v245_v51 = vld [vmem:[#allocation5 + $0x568] sm:$0xff] }
  0x65   :  { %2440 = vmatprep.subr.bf16.mxu0 %v3097_v31  ;;  %2569 = vmatprep.subr.bf16.mxu1 %v3099_v32  ;;  %v3155_v31 = vcombine.high %v217_v26, %v221_v27  ;;  %v224_v32 = vld [vmem:[#allocation5 + $0x4c0] sm:$0xff]  ;;  %v249_v59 = vld [vmem:[#allocation5 + $0x588] sm:$0xff] }
  0x66   :  { %v3160_v44 = vcombine.low %v224_v32, %v228_v33  ;;  %v253_v60 = vld [vmem:[#allocation5 + $0x5a8] sm:$0xff] }
  0x67   :  { %v257_v3 = vld [vmem:[#allocation5 + $0x5c8] sm:$0xff] }
  0x68   :  { %2441 = vmatpush1.bf16.msra.mxu0 %v3096_v37  ;;  %2570 = vmatpush1.bf16.msra.mxu1 %v3098_v38  ;;  %v3154_v37 = vcombine.low %v217_v26, %v221_v27  ;;  %v3161_v38 = vcombine.high %v224_v32, %v228_v33  ;;  %v261_v4 = vld [vmem:[#allocation5 + $0x5e8] sm:$0xff]  ;;  %v280_v27 = vld [vmem:[#allocation5 + $0x680] sm:$0xff] }
  0x69   :  { %2442 = vmatprep.subr.bf16.mxu0 %v3105_v39  ;;  %2571 = vmatprep.subr.bf16.mxu1 %v3107_v40  ;;  %v3163_v39 = vcombine.high %v225_v34, %v229_v35  ;;  %v232_v40 = vld [vmem:[#allocation5 + $0x500] sm:$0xff]  ;;  %v3195_v8 = vcombine.high %v257_v3, %v261_v4  ;;  %v269_v12 = vld [vmem:[#allocation5 + $0x628] sm:$0xff]  ;;  %v3194_v14 = vcombine.low %v257_v3, %v261_v4 }
  0x6a   :  { %v3168_v52 = vcombine.low %v232_v40, %v236_v41  ;;  %v320_v4 = vld [vmem:[#allocation5 + $0x7c0] sm:$0xff] }
  0x6c   :  { %2443 = vmatpush1.bf16.msra.mxu0 %v3104_v45  ;;  %2572 = vmatpush1.bf16.msra.mxu1 %v3106_v46  ;;  %v3162_v45 = vcombine.low %v225_v34, %v229_v35  ;;  %v3169_v46 = vcombine.high %v232_v40, %v236_v41  ;;  %v288_v35 = vld [vmem:[#allocation5 + $0x6c0] sm:$0xff] }
  0x6d   :  { %2444 = vmatprep.subr.bf16.mxu0 %v3113_v47  ;;  %2573 = vmatprep.subr.bf16.mxu1 %v3115_v48  ;;  %v3171_v47 = vcombine.high %v233_v42, %v237_v43  ;;  %v240_v48 = vld [vmem:[#allocation5 + $0x540] sm:$0xff] }
  0x6e   :  { %v3176_v61 = vcombine.low %v240_v48, %v244_v49 }
  0x70   :  { %2445 = vmatpush1.bf16.msra.mxu0 %v3112_v53  ;;  %2574 = vmatpush1.bf16.msra.mxu1 %v3114_v54  ;;  %v3170_v53 = vcombine.low %v233_v42, %v237_v43  ;;  %v3177_v54 = vcombine.high %v240_v48, %v244_v49  ;;  %v296_v43 = vld [vmem:[#allocation5 + $0x700] sm:$0xff] }
  0x71   :  { %2446 = vmatprep.subr.bf16.mxu0 %v3121_v55  ;;  %2575 = vmatprep.subr.bf16.mxu1 %v3123_v56  ;;  %v3179_v55 = vcombine.high %v241_v50, %v245_v51  ;;  %v248_v56 = vld [vmem:[#allocation5 + $0x580] sm:$0xff] }
  0x72   :  { %v3184_v5 = vcombine.low %v248_v56, %v252_v57 }
  0x74   :  { %2447 = vmatpush1.bf16.msra.mxu0 %v3120_v62  ;;  %2576 = vmatpush1.bf16.msra.mxu1 %v3122_v63  ;;  %v3178_v62 = vcombine.low %v241_v50, %v245_v51  ;;  %v3185_v63 = vcombine.high %v248_v56, %v252_v57  ;;  %v304_v51 = vld [vmem:[#allocation5 + $0x740] sm:$0xff] }
  0x75   :  { %2448 = vmatprep.subr.bf16.mxu0 %v3129_v0  ;;  %2577 = vmatprep.subr.bf16.mxu1 %v3131_v1  ;;  %v3187_v0 = vcombine.high %v249_v59, %v253_v60  ;;  %v256_v1 = vld [vmem:[#allocation5 + $0x5c0] sm:$0xff] }
  0x76   :  { %v3193_v7 = vcombine.high %v256_v1, %v260_v2  ;;  %v3192_v13 = vcombine.low %v256_v1, %v260_v2 }
  0x78   :  { %2449 = vmatpush1.bf16.msra.mxu0 %v3128_v6  ;;  %2578 = vmatpush1.bf16.msra.mxu1 %v3130_v9  ;;  %v3186_v6 = vcombine.low %v249_v59, %v253_v60  ;;  %v264_v9 = vld [vmem:[#allocation5 + $0x600] sm:$0xff] }
  0x79   :  { %2461 = vmatprep.subr.bf16.mxu0 %v3137_v10  ;;  %2590 = vmatprep.subr.bf16.mxu1 %v3139_v11  ;;  %v268_v10 = vld [vmem:[#allocation5 + $0x620] sm:$0xff]  ;;  %v265_v11 = vld [vmem:[#allocation5 + $0x608] sm:$0xff] }
  0x7a   :  { %v3201_v16 = vcombine.high %v264_v9, %v268_v10  ;;  %v3203_v17 = vcombine.high %v265_v11, %v269_v12  ;;  %v3202_v23 = vcombine.low %v265_v11, %v269_v12  ;;  %v312_v60 = vld [vmem:[#allocation5 + $0x780] sm:$0xff] }
  0x7b   :  { %2451 = vmatmul.mubr.bf16.vlgmr.msra.gmra.mrb[0].mxu0 %v3629_v15  ;;  %2580 = vmatmul.mubr.bf16.vlgmr.msra.gmra.mrb[0].mxu1 %v3629_v15  ;;  %v328_v12 = vld [vmem:[#allocation5 + $0x800] sm:$0xff] }
  0x7c   :  { %2462 = vmatpush1.bf16.msra.mxu0 %v3136_v19  ;;  %2591 = vmatpush1.bf16.msra.mxu1 %v3138_v20  ;;  %v276_v19 = vld [vmem:[#allocation5 + $0x660] sm:$0xff]  ;;  %v273_v20 = vld [vmem:[#allocation5 + $0x648] sm:$0xff] }
  0x7d   :  { %2463 = vmatprep.subr.bf16.mxu0 %v3145_v21  ;;  %2592 = vmatprep.subr.bf16.mxu1 %v3147_v22  ;;  %v277_v21 = vld [vmem:[#allocation5 + $0x668] sm:$0xff]  ;;  %v3200_v22 = vcombine.low %v264_v9, %v268_v10  ;;  %v3209_v24 = vcombine.high %v272_v18, %v276_v19 }
  0x7e   :  { %2493 = vmatprep.mubr.bf16.mxu0 %v3631_v25  ;;  %2622 = vmatprep.mubr.bf16.mxu1 %v3631_v25  ;;  %v3211_v26 = vcombine.high %v273_v20, %v277_v21  ;;  %v3210_v32 = vcombine.low %v273_v20, %v277_v21 }
  0x80   :  { %2464 = vmatpush1.bf16.msra.mxu0 %v3144_v28  ;;  %2593 = vmatpush1.bf16.msra.mxu1 %v3146_v29  ;;  %v284_v28 = vld [vmem:[#allocation5 + $0x6a0] sm:$0xff]  ;;  %v281_v29 = vld [vmem:[#allocation5 + $0x688] sm:$0xff] }
  0x81   :  { %2465 = vmatprep.subr.bf16.mxu0 %v3153_v30  ;;  %2594 = vmatprep.subr.bf16.mxu1 %v3155_v31  ;;  %v285_v30 = vld [vmem:[#allocation5 + $0x6a8] sm:$0xff]  ;;  %v3208_v31 = vcombine.low %v272_v18, %v276_v19  ;;  %v3217_v33 = vcombine.high %v280_v27, %v284_v28  ;;  %v56_v18 = vld [vmem:[#allocation2 + $0x10] sm:$0xff]  ;;  %v62_v19 = vld [vmem:[#allocation2 + $0x40] sm:$0xff] }
  0x82   :  { %v3219_v34 = vcombine.high %v281_v29, %v285_v30  ;;  %v3218_v40 = vcombine.low %v281_v29, %v285_v30  ;;  %v59_v29 = vld [vmem:[#allocation2 + $0x28] sm:$0xff]  ;;  %v65_v30 = vld [vmem:[#allocation2 + $0x58] sm:$0xff] }
  0x84   :  { %2466 = vmatpush1.bf16.msra.mxu0 %v3152_v36  ;;  %2595 = vmatpush1.bf16.msra.mxu1 %v3154_v37  ;;  %v292_v36 = vld [vmem:[#allocation5 + $0x6e0] sm:$0xff]  ;;  %v289_v37 = vld [vmem:[#allocation5 + $0x6c8] sm:$0xff] }
  0x85   :  { %2467 = vmatprep.subr.bf16.mxu0 %v3161_v38  ;;  %2596 = vmatprep.subr.bf16.mxu1 %v3163_v39  ;;  %v293_v38 = vld [vmem:[#allocation5 + $0x6e8] sm:$0xff]  ;;  %v3216_v39 = vcombine.low %v280_v27, %v284_v28  ;;  %v3225_v41 = vcombine.high %v288_v35, %v292_v36  ;;  %v3637_v27 = vpack.c.bf16 %v62_v19, %v56_v18 }
  0x86   :  { %v3227_v42 = vcombine.high %v289_v37, %v293_v38  ;;  %v3226_v48 = vcombine.low %v289_v37, %v293_v38  ;;  %v341_v28 = vld [vmem:[#allocation5 + $0x868] sm:$0xff]  ;;  %v3639_v37 = vpack.c.bf16 %v65_v30, %v59_v29 }
  0x87   :  { %v345_v38 = vld [vmem:[#allocation5 + $0x888] sm:$0xff] }
  0x88   :  { %2468 = vmatpush1.bf16.msra.mxu0 %v3160_v44  ;;  %2597 = vmatpush1.bf16.msra.mxu1 %v3162_v45  ;;  %v300_v44 = vld [vmem:[#allocation5 + $0x720] sm:$0xff]  ;;  %v297_v45 = vld [vmem:[#allocation5 + $0x708] sm:$0xff] }
  0x89   :  { %2469 = vmatprep.subr.bf16.mxu0 %v3169_v46  ;;  %2598 = vmatprep.subr.bf16.mxu1 %v3171_v47  ;;  %v301_v46 = vld [vmem:[#allocation5 + $0x728] sm:$0xff]  ;;  %v3224_v47 = vcombine.low %v288_v35, %v292_v36  ;;  %v3233_v49 = vcombine.high %v296_v43, %v300_v44  ;;  %v344_v35 = vld [vmem:[#allocation5 + $0x880] sm:$0xff] }
  0x8a   :  { %v3235_v50 = vcombine.high %v297_v45, %v301_v46  ;;  %v3234_v56 = vcombine.low %v297_v45, %v301_v46  ;;  %v348_v36 = vld [vmem:[#allocation5 + $0x8a0] sm:$0xff]  ;;  %v353_v46 = vld [vmem:[#allocation5 + $0x8c8] sm:$0xff] }
  0x8b   :  { %v356_v45 = vld [vmem:[#allocation5 + $0x8e0] sm:$0xff] }
  0x8c   :  { %2470 = vmatpush1.bf16.msra.mxu0 %v3168_v52  ;;  %2599 = vmatpush1.bf16.msra.mxu1 %v3170_v53  ;;  %v308_v52 = vld [vmem:[#allocation5 + $0x760] sm:$0xff]  ;;  %v305_v53 = vld [vmem:[#allocation5 + $0x748] sm:$0xff] }
  0x8d   :  { %2471 = vmatprep.subr.bf16.mxu0 %v3177_v54  ;;  %2600 = vmatprep.subr.bf16.mxu1 %v3179_v55  ;;  %v309_v54 = vld [vmem:[#allocation5 + $0x768] sm:$0xff]  ;;  %v3232_v55 = vcombine.low %v296_v43, %v300_v44  ;;  %v3241_v57 = vcombine.high %v304_v51, %v308_v52  ;;  %v352_v44 = vld [vmem:[#allocation5 + $0x8c0] sm:$0xff] }
  0x8e   :  { %v3243_v59 = vcombine.high %v305_v53, %v309_v54  ;;  %v3242_v1 = vcombine.low %v305_v53, %v309_v54  ;;  %v364_v53 = vld [vmem:[#allocation5 + $0x920] sm:$0xff]  ;;  %v361_v54 = vld [vmem:[#allocation5 + $0x908] sm:$0xff] }
  0x90   :  { %2472 = vmatpush1.bf16.msra.mxu0 %v3176_v61  ;;  %2601 = vmatpush1.bf16.msra.mxu1 %v3178_v62  ;;  %v316_v61 = vld [vmem:[#allocation5 + $0x7a0] sm:$0xff]  ;;  %v313_v62 = vld [vmem:[#allocation5 + $0x788] sm:$0xff] }
  0x91   :  { %2473 = vmatprep.subr.bf16.mxu0 %v3185_v63  ;;  %2602 = vmatprep.subr.bf16.mxu1 %v3187_v0  ;;  %v317_v63 = vld [vmem:[#allocation5 + $0x7a8] sm:$0xff]  ;;  %v3240_v0 = vcombine.low %v304_v51, %v308_v52  ;;  %v3249_v2 = vcombine.high %v312_v60, %v316_v61  ;;  %v360_v52 = vld [vmem:[#allocation5 + $0x900] sm:$0xff] }
  0x92   :  { %v3251_v3 = vcombine.high %v313_v62, %v317_v63  ;;  %v3250_v9 = vcombine.low %v313_v62, %v317_v63  ;;  %v372_v62 = vld [vmem:[#allocation5 + $0x960] sm:$0xff]  ;;  %v369_v63 = vld [vmem:[#allocation5 + $0x948] sm:$0xff] }
  0x94   :  { %2474 = vmatpush1.bf16.msra.mxu0 %v3184_v5  ;;  %2603 = vmatpush1.bf16.msra.mxu1 %v3186_v6  ;;  %v324_v5 = vld [vmem:[#allocation5 + $0x7e0] sm:$0xff]  ;;  %v321_v6 = vld [vmem:[#allocation5 + $0x7c8] sm:$0xff] }
  0x95   :  { %2475 = vmatprep.subr.bf16.mxu0 %v3193_v7  ;;  %2604 = vmatprep.subr.bf16.mxu1 %v3195_v8  ;;  %v325_v7 = vld [vmem:[#allocation5 + $0x7e8] sm:$0xff]  ;;  %v3248_v8 = vcombine.low %v312_v60, %v316_v61  ;;  %v3257_v10 = vcombine.high %v320_v4, %v324_v5  ;;  %v368_v61 = vld [vmem:[#allocation5 + $0x940] sm:$0xff] }
  0x96   :  { %v3259_v11 = vcombine.high %v321_v6, %v325_v7  ;;  %v3258_v20 = vcombine.low %v321_v6, %v325_v7  ;;  %v380_v6 = vld [vmem:[#allocation5 + $0x9a0] sm:$0xff]  ;;  %v377_v7 = vld [vmem:[#allocation5 + $0x988] sm:$0xff] }
  0x98   :  { %2476 = vmatpush1.bf16.msra.mxu0 %v3192_v13  ;;  %2605 = vmatpush1.bf16.msra.mxu1 %v3194_v14  ;;  %v332_v13 = vld [vmem:[#allocation5 + $0x820] sm:$0xff]  ;;  %v329_v14 = vld [vmem:[#allocation5 + $0x808] sm:$0xff] }
  0x99   :  { %2477 = vmatprep.subr.bf16.mxu0 %v3201_v16  ;;  %2606 = vmatprep.subr.bf16.mxu1 %v3203_v17  ;;  %v333_v16 = vld [vmem:[#allocation5 + $0x828] sm:$0xff]  ;;  %v3256_v17 = vcombine.low %v320_v4, %v324_v5  ;;  %v3265_v21 = vcombine.high %v328_v12, %v332_v13  ;;  %v376_v5 = vld [vmem:[#allocation5 + $0x980] sm:$0xff] }
  0x9a   :  { %v3312_v18 = vcombine.low %v376_v5, %v380_v6 }
  0x9c   :  { %2478 = vmatpush1.bf16.msra.mxu0 %v3200_v22  ;;  %2607 = vmatpush1.bf16.msra.mxu1 %v3202_v23  ;;  %v3267_v22 = vcombine.high %v329_v14, %v333_v16  ;;  %v336_v23 = vld [vmem:[#allocation5 + $0x840] sm:$0xff] }
  0x9d   :  { %2479 = vmatprep.subr.bf16.mxu0 %v3209_v24  ;;  %2608 = vmatprep.subr.bf16.mxu1 %v3211_v26  ;;  %v340_v24 = vld [vmem:[#allocation5 + $0x860] sm:$0xff]  ;;  %v337_v26 = vld [vmem:[#allocation5 + $0x848] sm:$0xff] }
  0xa0   :  { %2480 = vmatpush1.bf16.msra.mxu0 %v3208_v31  ;;  %2609 = vmatpush1.bf16.msra.mxu1 %v3210_v32  ;;  %v3264_v31 = vcombine.low %v328_v12, %v332_v13  ;;  %v3266_v32 = vcombine.low %v329_v14, %v333_v16  ;;  %v384_v13 = vld [vmem:[#allocation5 + $0x9c0] sm:$0xff]  ;;  %v385_v16 = vld [vmem:[#allocation5 + $0x9c8] sm:$0xff] }
  0xa1   :  { %2481 = vmatprep.subr.bf16.mxu0 %v3217_v33  ;;  %2610 = vmatprep.subr.bf16.mxu1 %v3219_v34  ;;  %v3273_v33 = vcombine.high %v336_v23, %v340_v24  ;;  %v3275_v34 = vcombine.high %v337_v26, %v341_v28  ;;  %v388_v14 = vld [vmem:[#allocation5 + $0x9e0] sm:$0xff] }
  0xa4   :  { %2482 = vmatpush1.bf16.msra.mxu0 %v3216_v39  ;;  %2611 = vmatpush1.bf16.msra.mxu1 %v3218_v40  ;;  %v349_v39 = vld [vmem:[#allocation5 + $0x8a8] sm:$0xff]  ;;  %v3272_v40 = vcombine.low %v336_v23, %v340_v24  ;;  %v396_v23 = vld [vmem:[#allocation5 + $0xa20] sm:$0xff] }
  0xa5   :  { %2483 = vmatprep.subr.bf16.mxu0 %v3225_v41  ;;  %2612 = vmatprep.subr.bf16.mxu1 %v3227_v42  ;;  %v3274_v41 = vcombine.low %v337_v26, %v341_v28  ;;  %v3281_v42 = vcombine.high %v344_v35, %v348_v36  ;;  %v3283_v43 = vcombine.high %v345_v38, %v349_v39  ;;  %v393_v24 = vld [vmem:[#allocation5 + $0xa08] sm:$0xff] }
  0xa6   :  { %v397_v26 = vld [vmem:[#allocation5 + $0xa28] sm:$0xff]  ;;  %v3320_v28 = vcombine.low %v384_v13, %v388_v14 }
  0xa8   :  { %2484 = vmatpush1.bf16.msra.mxu0 %v3224_v47  ;;  %2613 = vmatpush1.bf16.msra.mxu1 %v3226_v48  ;;  %v357_v47 = vld [vmem:[#allocation5 + $0x8e8] sm:$0xff]  ;;  %v3280_v48 = vcombine.low %v344_v35, %v348_v36 }
  0xa9   :  { %2485 = vmatprep.subr.bf16.mxu0 %v3233_v49  ;;  %2614 = vmatprep.subr.bf16.mxu1 %v3235_v50  ;;  %v3282_v49 = vcombine.low %v345_v38, %v349_v39  ;;  %v3289_v50 = vcombine.high %v352_v44, %v356_v45  ;;  %v3291_v51 = vcombine.high %v353_v46, %v357_v47  ;;  %v405_v35 = vld [vmem:[#allocation5 + $0xa68] sm:$0xff] }
  0xaa   :  { %v3330_v38 = vcombine.low %v393_v24, %v397_v26 }
  0xac   :  { %2486 = vmatpush1.bf16.msra.mxu0 %v3232_v55  ;;  %2615 = vmatpush1.bf16.msra.mxu1 %v3234_v56  ;;  %v365_v55 = vld [vmem:[#allocation5 + $0x928] sm:$0xff]  ;;  %v3288_v56 = vcombine.low %v352_v44, %v356_v45 }
  0xad   :  { %2487 = vmatprep.subr.bf16.mxu0 %v3241_v57  ;;  %2616 = vmatprep.subr.bf16.mxu1 %v3243_v59  ;;  %v3290_v57 = vcombine.low %v353_v46, %v357_v47  ;;  %v3297_v59 = vcombine.high %v360_v52, %v364_v53  ;;  %v3299_v60 = vcombine.high %v361_v54, %v365_v55  ;;  %v413_v44 = vld [vmem:[#allocation5 + $0xaa8] sm:$0xff] }
  0xb0   :  { %2488 = vmatpush1.bf16.msra.mxu0 %v3240_v0  ;;  %2617 = vmatpush1.bf16.msra.mxu1 %v3242_v1  ;;  %v373_v0 = vld [vmem:[#allocation5 + $0x968] sm:$0xff]  ;;  %v3296_v1 = vcombine.low %v360_v52, %v364_v53 }
  0xb1   :  { %2489 = vmatprep.subr.bf16.mxu0 %v3249_v2  ;;  %2618 = vmatprep.subr.bf16.mxu1 %v3251_v3  ;;  %v3298_v2 = vcombine.low %v361_v54, %v365_v55  ;;  %v3305_v3 = vcombine.high %v368_v61, %v372_v62  ;;  %v3307_v4 = vcombine.high %v369_v63, %v373_v0  ;;  %v421_v52 = vld [vmem:[#allocation5 + $0xae8] sm:$0xff] }
  0xb4   :  { %2490 = vmatpush1.bf16.msra.mxu0 %v3248_v8  ;;  %2619 = vmatpush1.bf16.msra.mxu1 %v3250_v9  ;;  %v381_v8 = vld [vmem:[#allocation5 + $0x9a8] sm:$0xff]  ;;  %v3304_v9 = vcombine.low %v368_v61, %v372_v62 }
  0xb5   :  { %2491 = vmatprep.subr.bf16.mxu0 %v3257_v10  ;;  %2620 = vmatprep.subr.bf16.mxu1 %v3259_v11  ;;  %v3306_v10 = vcombine.low %v369_v63, %v373_v0  ;;  %v3313_v11 = vcombine.high %v376_v5, %v380_v6  ;;  %v3315_v12 = vcombine.high %v377_v7, %v381_v8  ;;  %v429_v61 = vld [vmem:[#allocation5 + $0xb28] sm:$0xff] }
  0xb6   :  { %v3314_v19 = vcombine.low %v377_v7, %v381_v8  ;;  %v437_v5 = vld [vmem:[#allocation5 + $0xb68] sm:$0xff] }
  0xb8   :  { %2492 = vmatpush1.bf16.msra.mxu0 %v3256_v17  ;;  %2621 = vmatpush1.bf16.msra.mxu1 %v3258_v20  ;;  %v389_v17 = vld [vmem:[#allocation5 + $0x9e8] sm:$0xff]  ;;  %v3321_v20 = vcombine.high %v384_v13, %v388_v14 }
  0xb9   :  { %2504 = vmatprep.subr.bf16.mxu0 %v3265_v21  ;;  %2633 = vmatprep.subr.bf16.mxu1 %v3267_v22  ;;  %v3323_v21 = vcombine.high %v385_v16, %v389_v17  ;;  %v392_v22 = vld [vmem:[#allocation5 + $0xa00] sm:$0xff]  ;;  %v3322_v29 = vcombine.low %v385_v16, %v389_v17  ;;  %v445_v13 = vld [vmem:[#allocation5 + $0xba8] sm:$0xff] }
  0xba   :  { %v3329_v30 = vcombine.high %v392_v22, %v396_v23  ;;  %v3328_v36 = vcombine.low %v392_v22, %v396_v23  ;;  %v453_v22 = vld [vmem:[#allocation5 + $0xbe8] sm:$0xff] }
  0xbb   :  { %2494 = vmatmul.mubr.bf16.vlgmr.msra.gmra.mrb[0].mxu0 %v3637_v27  ;;  %2623 = vmatmul.mubr.bf16.vlgmr.msra.gmra.mrb[0].mxu1 %v3637_v27 }
  0xbc   :  { %2505 = vmatpush1.bf16.msra.mxu0 %v3264_v31  ;;  %2634 = vmatpush1.bf16.msra.mxu1 %v3266_v32  ;;  %v3331_v31 = vcombine.high %v393_v24, %v397_v26  ;;  %v400_v32 = vld [vmem:[#allocation5 + $0xa40] sm:$0xff] }
  0xbd   :  { %2506 = vmatprep.subr.bf16.mxu0 %v3273_v33  ;;  %2635 = vmatprep.subr.bf16.mxu1 %v3275_v34  ;;  %v404_v33 = vld [vmem:[#allocation5 + $0xa60] sm:$0xff]  ;;  %v401_v34 = vld [vmem:[#allocation5 + $0xa48] sm:$0xff] }
  0xbe   :  { %2536 = vmatprep.mubr.bf16.mxu0 %v3639_v37  ;;  %2665 = vmatprep.mubr.bf16.mxu1 %v3639_v37  ;;  %v3337_v39 = vcombine.high %v400_v32, %v404_v33  ;;  %v3336_v45 = vcombine.low %v400_v32, %v404_v33  ;;  %v3338_v46 = vcombine.low %v401_v34, %v405_v35  ;;  %v79_v32 = vld [vmem:[#allocation5 + $0x38] sm:$0xff] }
  0xc0   :  { %2507 = vmatpush1.bf16.msra.mxu0 %v3272_v40  ;;  %2636 = vmatpush1.bf16.msra.mxu1 %v3274_v41  ;;  %v3339_v40 = vcombine.high %v401_v34, %v405_v35  ;;  %v408_v41 = vld [vmem:[#allocation5 + $0xa80] sm:$0xff]  ;;  %v64_v35 = vld [vmem:[#allocation2 + $0x50] sm:$0xff] }
  0xc1   :  { %2508 = vmatprep.subr.bf16.mxu0 %v3281_v42  ;;  %2637 = vmatprep.subr.bf16.mxu1 %v3283_v43  ;;  %v412_v42 = vld [vmem:[#allocation5 + $0xaa0] sm:$0xff]  ;;  %v409_v43 = vld [vmem:[#allocation5 + $0xa88] sm:$0xff] }
  0xc2   :  { %v3345_v47 = vcombine.high %v408_v41, %v412_v42  ;;  %v3344_v53 = vcombine.low %v408_v41, %v412_v42  ;;  %v3346_v54 = vcombine.low %v409_v43, %v413_v44  ;;  %v58_v34 = vld [vmem:[#allocation2 + $0x20] sm:$0xff]  ;;  %v86_v41 = vld [vmem:[#allocation5 + $0x70] sm:$0xff] }
  0xc3   :  { %v3645_v42 = vpack.c.bf16 %v64_v35, %v58_v34 }
  0xc4   :  { %2509 = vmatpush1.bf16.msra.mxu0 %v3280_v48  ;;  %2638 = vmatpush1.bf16.msra.mxu1 %v3282_v49  ;;  %v3347_v48 = vcombine.high %v409_v43, %v413_v44  ;;  %v416_v49 = vld [vmem:[#allocation5 + $0xac0] sm:$0xff]  ;;  %v83_v43 = vld [vmem:[#allocation5 + $0x58] sm:$0xff] }
  0xc5   :  { %2510 = vmatprep.subr.bf16.mxu0 %v3289_v50  ;;  %2639 = vmatprep.subr.bf16.mxu1 %v3291_v51  ;;  %v420_v50 = vld [vmem:[#allocation5 + $0xae0] sm:$0xff]  ;;  %v417_v51 = vld [vmem:[#allocation5 + $0xac8] sm:$0xff]  ;;  %v87_v44 = vld [vmem:[#allocation5 + $0x78] sm:$0xff] }
  0xc6   :  { %v3353_v55 = vcombine.high %v416_v49, %v420_v50  ;;  %v3352_v62 = vcombine.low %v416_v49, %v420_v50  ;;  %v3354_v63 = vcombine.low %v417_v51, %v421_v52  ;;  %v90_v49 = vld [vmem:[#allocation5 + $0x90] sm:$0xff] }
  0xc7   :  { %v94_v50 = vld [vmem:[#allocation5 + $0xb0] sm:$0xff] }
  0xc8   :  { %2511 = vmatpush1.bf16.msra.mxu0 %v3288_v56  ;;  %2640 = vmatpush1.bf16.msra.mxu1 %v3290_v57  ;;  %v3355_v56 = vcombine.high %v417_v51, %v421_v52  ;;  %v424_v57 = vld [vmem:[#allocation5 + $0xb00] sm:$0xff]  ;;  %v91_v51 = vld [vmem:[#allocation5 + $0x98] sm:$0xff] }
  0xc9   :  { %2512 = vmatprep.subr.bf16.mxu0 %v3297_v59  ;;  %2641 = vmatprep.subr.bf16.mxu1 %v3299_v60  ;;  %v428_v59 = vld [vmem:[#allocation5 + $0xb20] sm:$0xff]  ;;  %v425_v60 = vld [vmem:[#allocation5 + $0xb08] sm:$0xff]  ;;  %v95_v52 = vld [vmem:[#allocation5 + $0xb8] sm:$0xff] }
  0xca   :  { %v3361_v0 = vcombine.high %v424_v57, %v428_v59  ;;  %v3360_v6 = vcombine.low %v424_v57, %v428_v59  ;;  %v3362_v7 = vcombine.low %v425_v60, %v429_v61  ;;  %v98_v57 = vld [vmem:[#allocation5 + $0xd0] sm:$0xff] }
  0xcb   :  { %v102_v59 = vld [vmem:[#allocation5 + $0xf0] sm:$0xff] }
  0xcc   :  { %2513 = vmatpush1.bf16.msra.mxu0 %v3296_v1  ;;  %2642 = vmatpush1.bf16.msra.mxu1 %v3298_v2  ;;  %v3363_v1 = vcombine.high %v425_v60, %v429_v61  ;;  %v432_v2 = vld [vmem:[#allocation5 + $0xb40] sm:$0xff]  ;;  %v99_v60 = vld [vmem:[#allocation5 + $0xd8] sm:$0xff] }
  0xcd   :  { %2514 = vmatprep.subr.bf16.mxu0 %v3305_v3  ;;  %2643 = vmatprep.subr.bf16.mxu1 %v3307_v4  ;;  %v436_v3 = vld [vmem:[#allocation5 + $0xb60] sm:$0xff]  ;;  %v433_v4 = vld [vmem:[#allocation5 + $0xb48] sm:$0xff]  ;;  %v103_v61 = vld [vmem:[#allocation5 + $0xf8] sm:$0xff] }
  0xce   :  { %v3369_v8 = vcombine.high %v432_v2, %v436_v3  ;;  %v3368_v14 = vcombine.low %v432_v2, %v436_v3  ;;  %v3370_v16 = vcombine.low %v433_v4, %v437_v5  ;;  %v106_v2 = vld [vmem:[#allocation5 + $0x110] sm:$0xff] }
  0xcf   :  { %v110_v3 = vld [vmem:[#allocation5 + $0x130] sm:$0xff] }
  0xd0   :  { %2515 = vmatpush1.bf16.msra.mxu0 %v3304_v9  ;;  %2644 = vmatpush1.bf16.msra.mxu1 %v3306_v10  ;;  %v3371_v9 = vcombine.high %v433_v4, %v437_v5  ;;  %v440_v10 = vld [vmem:[#allocation5 + $0xb80] sm:$0xff]  ;;  %v107_v4 = vld [vmem:[#allocation5 + $0x118] sm:$0xff] }
  0xd1   :  { %2516 = vmatprep.subr.bf16.mxu0 %v3313_v11  ;;  %2645 = vmatprep.subr.bf16.mxu1 %v3315_v12  ;;  %v444_v11 = vld [vmem:[#allocation5 + $0xba0] sm:$0xff]  ;;  %v441_v12 = vld [vmem:[#allocation5 + $0xb88] sm:$0xff]  ;;  %v111_v5 = vld [vmem:[#allocation5 + $0x138] sm:$0xff] }
  0xd2   :  { %v3377_v17 = vcombine.high %v440_v10, %v444_v11  ;;  %v3376_v23 = vcombine.low %v440_v10, %v444_v11  ;;  %v3378_v24 = vcombine.low %v441_v12, %v445_v13  ;;  %v118_v10 = vld [vmem:[#allocation5 + $0x170] sm:$0xff]  ;;  %v115_v11 = vld [vmem:[#allocation5 + $0x158] sm:$0xff] }
  0xd4   :  { %2517 = vmatpush1.bf16.msra.mxu0 %v3312_v18  ;;  %2646 = vmatpush1.bf16.msra.mxu1 %v3314_v19  ;;  %v3379_v18 = vcombine.high %v441_v12, %v445_v13  ;;  %v448_v19 = vld [vmem:[#allocation5 + $0xbc0] sm:$0xff]  ;;  %v119_v12 = vld [vmem:[#allocation5 + $0x178] sm:$0xff]  ;;  %v3044_v13 = vcombine.low %v106_v2, %v110_v3 }
  0xd5   :  { %2518 = vmatprep.subr.bf16.mxu0 %v3321_v20  ;;  %2647 = vmatprep.subr.bf16.mxu1 %v3323_v21  ;;  %v452_v20 = vld [vmem:[#allocation5 + $0xbe0] sm:$0xff]  ;;  %v449_v21 = vld [vmem:[#allocation5 + $0xbc8] sm:$0xff] }
  0xd6   :  { %v3385_v26 = vcombine.high %v448_v19, %v452_v20  ;;  %v3384_v33 = vcombine.low %v448_v19, %v452_v20  ;;  %v126_v19 = vld [vmem:[#allocation5 + $0x1b0] sm:$0xff]  ;;  %v123_v20 = vld [vmem:[#allocation5 + $0x198] sm:$0xff] }
  0xd8   :  { %2519 = vmatpush1.bf16.msra.mxu0 %v3320_v28  ;;  %2648 = vmatpush1.bf16.msra.mxu1 %v3322_v29  ;;  %v3387_v28 = vcombine.high %v449_v21, %v453_v22  ;;  %v74_v29 = vld [vmem:[#allocation5 + $0x10] sm:$0xff] }
  0xd9   :  { %2520 = vmatprep.subr.bf16.mxu0 %v3329_v30  ;;  %2649 = vmatprep.subr.bf16.mxu1 %v3331_v31  ;;  %v78_v30 = vld [vmem:[#allocation5 + $0x30] sm:$0xff]  ;;  %v75_v31 = vld [vmem:[#allocation5 + $0x18] sm:$0xff] }
  0xdc   :  { %2521 = vmatpush1.bf16.msra.mxu0 %v3328_v36  ;;  %2650 = vmatpush1.bf16.msra.mxu1 %v3330_v38  ;;  %v3386_v36 = vcombine.low %v449_v21, %v453_v22  ;;  %v3013_v38 = vcombine.high %v74_v29, %v78_v30  ;;  %v127_v21 = vld [vmem:[#allocation5 + $0x1b8] sm:$0xff] }
  0xdd   :  { %2522 = vmatprep.subr.bf16.mxu0 %v3337_v39  ;;  %2651 = vmatprep.subr.bf16.mxu1 %v3339_v40  ;;  %v3015_v39 = vcombine.high %v75_v31, %v79_v32  ;;  %v82_v40 = vld [vmem:[#allocation5 + $0x50] sm:$0xff] }
  0xe0   :  { %2523 = vmatpush1.bf16.msra.mxu0 %v3336_v45  ;;  %2652 = vmatpush1.bf16.msra.mxu1 %v3338_v46  ;;  %v3012_v45 = vcombine.low %v74_v29, %v78_v30  ;;  %v3014_v46 = vcombine.low %v75_v31, %v79_v32  ;;  %v134_v29 = vld [vmem:[#allocation5 + $0x1f0] sm:$0xff]  ;;  %v131_v30 = vld [vmem:[#allocation5 + $0x1d8] sm:$0xff] }
  0xe1   :  { %2524 = vmatprep.subr.bf16.mxu0 %v3345_v47  ;;  %2653 = vmatprep.subr.bf16.mxu1 %v3347_v48  ;;  %v3021_v47 = vcombine.high %v82_v40, %v86_v41  ;;  %v3023_v48 = vcombine.high %v83_v43, %v87_v44  ;;  %v135_v31 = vld [vmem:[#allocation5 + $0x1f8] sm:$0xff] }
  0xe2   :  { %v3071_v35 = vcombine.high %v131_v30, %v135_v31 }
  0xe4   :  { %2525 = vmatpush1.bf16.msra.mxu0 %v3344_v53  ;;  %2654 = vmatpush1.bf16.msra.mxu1 %v3346_v54  ;;  %v3020_v53 = vcombine.low %v82_v40, %v86_v41  ;;  %v3022_v54 = vcombine.low %v83_v43, %v87_v44  ;;  %v143_v40 = vld [vmem:[#allocation5 + $0x238] sm:$0xff]  ;;  %v3070_v43 = vcombine.low %v131_v30, %v135_v31 }
  0xe5   :  { %2526 = vmatprep.subr.bf16.mxu0 %v3353_v55  ;;  %2655 = vmatprep.subr.bf16.mxu1 %v3355_v56  ;;  %v3029_v55 = vcombine.high %v90_v49, %v94_v50  ;;  %v3031_v56 = vcombine.high %v91_v51, %v95_v52 }
  0xe8   :  { %2527 = vmatpush1.bf16.msra.mxu0 %v3352_v62  ;;  %2656 = vmatpush1.bf16.msra.mxu1 %v3354_v63  ;;  %v3028_v62 = vcombine.low %v90_v49, %v94_v50  ;;  %v3030_v63 = vcombine.low %v91_v51, %v95_v52  ;;  %v151_v49 = vld [vmem:[#allocation5 + $0x278] sm:$0xff] }
  0xe9   :  { %2528 = vmatprep.subr.bf16.mxu0 %v3361_v0  ;;  %2657 = vmatprep.subr.bf16.mxu1 %v3363_v1  ;;  %v3037_v0 = vcombine.high %v98_v57, %v102_v59  ;;  %v3039_v1 = vcombine.high %v99_v60, %v103_v61 }
  0xec   :  { %2529 = vmatpush1.bf16.msra.mxu0 %v3360_v6  ;;  %2658 = vmatpush1.bf16.msra.mxu1 %v3362_v7  ;;  %v3036_v6 = vcombine.low %v98_v57, %v102_v59  ;;  %v3038_v7 = vcombine.low %v99_v60, %v103_v61  ;;  %v159_v57 = vld [vmem:[#allocation5 + $0x2b8] sm:$0xff] }
  0xed   :  { %2530 = vmatprep.subr.bf16.mxu0 %v3369_v8  ;;  %2659 = vmatprep.subr.bf16.mxu1 %v3371_v9  ;;  %v3045_v8 = vcombine.high %v106_v2, %v110_v3  ;;  %v114_v9 = vld [vmem:[#allocation5 + $0x150] sm:$0xff]  ;;  %v167_v2 = vld [vmem:[#allocation5 + $0x2f8] sm:$0xff] }
  0xee   :  { %v3052_v22 = vcombine.low %v114_v9, %v118_v10 }
  0xf0   :  { %2531 = vmatpush1.bf16.msra.mxu0 %v3368_v14  ;;  %2660 = vmatpush1.bf16.msra.mxu1 %v3370_v16  ;;  %v3046_v14 = vcombine.low %v107_v4, %v111_v5  ;;  %v3053_v16 = vcombine.high %v114_v9, %v118_v10  ;;  %v175_v9 = vld [vmem:[#allocation5 + $0x338] sm:$0xff] }
  0xf1   :  { %2532 = vmatprep.subr.bf16.mxu0 %v3377_v17  ;;  %2661 = vmatprep.subr.bf16.mxu1 %v3379_v18  ;;  %v3055_v17 = vcombine.high %v115_v11, %v119_v12  ;;  %v122_v18 = vld [vmem:[#allocation5 + $0x190] sm:$0xff] }
  0xf2   :  { %v3060_v32 = vcombine.low %v122_v18, %v126_v19 }
  0xf4   :  { %2533 = vmatpush1.bf16.msra.mxu0 %v3376_v23  ;;  %2662 = vmatpush1.bf16.msra.mxu1 %v3378_v24  ;;  %v3054_v23 = vcombine.low %v115_v11, %v119_v12  ;;  %v3061_v24 = vcombine.high %v122_v18, %v126_v19  ;;  %v183_v18 = vld [vmem:[#allocation5 + $0x378] sm:$0xff] }
  0xf5   :  { %2534 = vmatprep.subr.bf16.mxu0 %v3385_v26  ;;  %2663 = vmatprep.subr.bf16.mxu1 %v3387_v28  ;;  %v3063_v26 = vcombine.high %v123_v20, %v127_v21  ;;  %v130_v28 = vld [vmem:[#allocation5 + $0x1d0] sm:$0xff] }
  0xf6   :  { %v3069_v34 = vcombine.high %v130_v28, %v134_v29  ;;  %v3068_v41 = vcombine.low %v130_v28, %v134_v29  ;;  %v191_v28 = vld [vmem:[#allocation5 + $0x3b8] sm:$0xff] }
  0xf8   :  { %2535 = vmatpush1.bf16.msra.mxu0 %v3384_v33  ;;  %2664 = vmatpush1.bf16.msra.mxu1 %v3386_v36  ;;  %v3062_v33 = vcombine.low %v123_v20, %v127_v21  ;;  %v138_v36 = vld [vmem:[#allocation5 + $0x210] sm:$0xff] }
  0xf9   :  { %2676 = vmatprep.subr.bf16.mxu0 %v3013_v38  ;;  %2805 = vmatprep.subr.bf16.mxu1 %v3015_v39  ;;  %v142_v38 = vld [vmem:[#allocation5 + $0x230] sm:$0xff]  ;;  %v139_v39 = vld [vmem:[#allocation5 + $0x218] sm:$0xff] }
  0xfa   :  { %v3077_v44 = vcombine.high %v138_v36, %v142_v38  ;;  %v3076_v50 = vcombine.low %v138_v36, %v142_v38  ;;  %v3078_v51 = vcombine.low %v139_v39, %v143_v40  ;;  %v199_v36 = vld [vmem:[#allocation5 + $0x3f8] sm:$0xff] }
  0xfb   :  { %2537 = vmatmul.mubr.bf16.vlgmr.msra.gmra.mrb[0].mxu0 %v3645_v42  ;;  %2666 = vmatmul.mubr.bf16.vlgmr.msra.gmra.mrb[0].mxu1 %v3645_v42 }
  0xfc   :  { %2677 = vmatpush1.bf16.msra.mxu0 %v3012_v45  ;;  %2806 = vmatpush1.bf16.msra.mxu1 %v3014_v46  ;;  %v3079_v45 = vcombine.high %v139_v39, %v143_v40  ;;  %v146_v46 = vld [vmem:[#allocation5 + $0x250] sm:$0xff] }
  0xfd   :  { %2678 = vmatprep.subr.bf16.mxu0 %v3021_v47  ;;  %2807 = vmatprep.subr.bf16.mxu1 %v3023_v48  ;;  %v150_v47 = vld [vmem:[#allocation5 + $0x270] sm:$0xff]  ;;  %v147_v48 = vld [vmem:[#allocation5 + $0x258] sm:$0xff] }
  0xfe   :  { %2708 = vmatprep.mubr.bf16.mxu0 %v3625_v58  ;;  %2837 = vmatprep.mubr.bf16.mxu1 %v3625_v58  ;;  %v3047_v58 = vcombine.high %v107_v4, %v111_v5  ;;  %v3085_v52 = vcombine.high %v146_v46, %v150_v47  ;;  %v3084_v59 = vcombine.low %v146_v46, %v150_v47  ;;  %v207_v46 = vld [vmem:[#allocation5 + $0x438] sm:$0xff] }
  0xff   :  { %v3086_v60 = vcombine.low %v147_v48, %v151_v49 }
 0x100   :  { %2679 = vmatpush1.bf16.msra.mxu0 %v3020_v53  ;;  %2808 = vmatpush1.bf16.msra.mxu1 %v3022_v54  ;;  %v3087_v53 = vcombine.high %v147_v48, %v151_v49  ;;  %v154_v54 = vld [vmem:[#allocation5 + $0x290] sm:$0xff] }
 0x101   :  { %2680 = vmatprep.subr.bf16.mxu0 %v3029_v55  ;;  %2809 = vmatprep.subr.bf16.mxu1 %v3031_v56  ;;  %v158_v55 = vld [vmem:[#allocation5 + $0x2b0] sm:$0xff]  ;;  %v155_v56 = vld [vmem:[#allocation5 + $0x298] sm:$0xff] }
 0x102   :  { %v3093_v61 = vcombine.high %v154_v54, %v158_v55  ;;  %v3092_v3 = vcombine.low %v154_v54, %v158_v55  ;;  %v3094_v4 = vcombine.low %v155_v56, %v159_v57  ;;  %v215_v54 = vld [vmem:[#allocation5 + $0x478] sm:$0xff] }
 0x104   :  { %2681 = vmatpush1.bf16.msra.mxu0 %v3028_v62  ;;  %2810 = vmatpush1.bf16.msra.mxu1 %v3030_v63  ;;  %v3095_v62 = vcombine.high %v155_v56, %v159_v57  ;;  %v162_v63 = vld [vmem:[#allocation5 + $0x2d0] sm:$0xff] }
 0x105   :  { %2682 = vmatprep.subr.bf16.mxu0 %v3037_v0  ;;  %2811 = vmatprep.subr.bf16.mxu1 %v3039_v1  ;;  %v166_v0 = vld [vmem:[#allocation5 + $0x2f0] sm:$0xff]  ;;  %v163_v1 = vld [vmem:[#allocation5 + $0x2d8] sm:$0xff] }
 0x106   :  { %v3101_v5 = vcombine.high %v162_v63, %v166_v0  ;;  %v3100_v10 = vcombine.low %v162_v63, %v166_v0  ;;  %v3102_v11 = vcombine.low %v163_v1, %v167_v2  ;;  %v223_v63 = vld [vmem:[#allocation5 + $0x4b8] sm:$0xff] }
 0x108   :  { %2683 = vmatpush1.bf16.msra.mxu0 %v3036_v6  ;;  %2812 = vmatpush1.bf16.msra.mxu1 %v3038_v7  ;;  %v3103_v6 = vcombine.high %v163_v1, %v167_v2  ;;  %v170_v7 = vld [vmem:[#allocation5 + $0x310] sm:$0xff] }
 0x109   :  { %2684 = vmatprep.subr.bf16.mxu0 %v3045_v8  ;;  %2813 = vmatprep.subr.bf16.mxu1 %v3047_v58  ;;  %v174_v8 = vld [vmem:[#allocation5 + $0x330] sm:$0xff]  ;;  %v171_v58 = vld [vmem:[#allocation5 + $0x318] sm:$0xff] }
 0x10a   :  { %v3109_v12 = vcombine.high %v170_v7, %v174_v8  ;;  %v3108_v19 = vcombine.low %v170_v7, %v174_v8  ;;  %v3110_v20 = vcombine.low %v171_v58, %v175_v9  ;;  %v231_v7 = vld [vmem:[#allocation5 + $0x4f8] sm:$0xff] }
 0x10c   :  { %2685 = vmatpush1.bf16.msra.mxu0 %v3044_v13  ;;  %2814 = vmatpush1.bf16.msra.mxu1 %v3046_v14  ;;  %v3111_v13 = vcombine.high %v171_v58, %v175_v9  ;;  %v178_v14 = vld [vmem:[#allocation5 + $0x350] sm:$0xff] }
 0x10d   :  { %2686 = vmatprep.subr.bf16.mxu0 %v3053_v16  ;;  %2815 = vmatprep.subr.bf16.mxu1 %v3055_v17  ;;  %v182_v16 = vld [vmem:[#allocation5 + $0x370] sm:$0xff]  ;;  %v179_v17 = vld [vmem:[#allocation5 + $0x358] sm:$0xff] }
 0x10e   :  { %v3117_v21 = vcombine.high %v178_v14, %v182_v16  ;;  %v3116_v29 = vcombine.low %v178_v14, %v182_v16  ;;  %v3118_v30 = vcombine.low %v179_v17, %v183_v18 }
 0x110   :  { %2687 = vmatpush1.bf16.msra.mxu0 %v3052_v22  ;;  %2816 = vmatpush1.bf16.msra.mxu1 %v3054_v23  ;;  %v3119_v22 = vcombine.high %v179_v17, %v183_v18  ;;  %v186_v23 = vld [vmem:[#allocation5 + $0x390] sm:$0xff] }
 0x111   :  { %2688 = vmatprep.subr.bf16.mxu0 %v3061_v24  ;;  %2817 = vmatprep.subr.bf16.mxu1 %v3063_v26  ;;  %v190_v24 = vld [vmem:[#allocation5 + $0x3b0] sm:$0xff]  ;;  %v187_v26 = vld [vmem:[#allocation5 + $0x398] sm:$0xff] }
 0x112   :  { %v3125_v31 = vcombine.high %v186_v23, %v190_v24  ;;  %v3124_v38 = vcombine.low %v186_v23, %v190_v24  ;;  %v3126_v39 = vcombine.low %v187_v26, %v191_v28  ;;  %v242_v18 = vld [vmem:[#allocation5 + $0x550] sm:$0xff] }
 0x114   :  { %2689 = vmatpush1.bf16.msra.mxu0 %v3060_v32  ;;  %2818 = vmatpush1.bf16.msra.mxu1 %v3062_v33  ;;  %v3127_v32 = vcombine.high %v187_v26, %v191_v28  ;;  %v194_v33 = vld [vmem:[#allocation5 + $0x3d0] sm:$0xff] }
 0x115   :  { %2690 = vmatprep.subr.bf16.mxu0 %v3069_v34  ;;  %2819 = vmatprep.subr.bf16.mxu1 %v3071_v35  ;;  %v198_v34 = vld [vmem:[#allocation5 + $0x3f0] sm:$0xff]  ;;  %v195_v35 = vld [vmem:[#allocation5 + $0x3d8] sm:$0xff] }
 0x116   :  { %v3133_v40 = vcombine.high %v194_v33, %v198_v34  ;;  %v3132_v47 = vcombine.low %v194_v33, %v198_v34  ;;  %v3134_v48 = vcombine.low %v195_v35, %v199_v36  ;;  %v250_v28 = vld [vmem:[#allocation5 + $0x590] sm:$0xff] }
 0x118   :  { %2691 = vmatpush1.bf16.msra.mxu0 %v3068_v41  ;;  %2820 = vmatpush1.bf16.msra.mxu1 %v3070_v43  ;;  %v3135_v41 = vcombine.high %v195_v35, %v199_v36  ;;  %v202_v43 = vld [vmem:[#allocation5 + $0x410] sm:$0xff] }
 0x119   :  { %2692 = vmatprep.subr.bf16.mxu0 %v3077_v44  ;;  %2821 = vmatprep.subr.bf16.mxu1 %v3079_v45  ;;  %v206_v44 = vld [vmem:[#allocation5 + $0x430] sm:$0xff]  ;;  %v203_v45 = vld [vmem:[#allocation5 + $0x418] sm:$0xff] }
 0x11a   :  { %v3141_v49 = vcombine.high %v202_v43, %v206_v44  ;;  %v3140_v55 = vcombine.low %v202_v43, %v206_v44  ;;  %v3142_v56 = vcombine.low %v203_v45, %v207_v46  ;;  %v258_v36 = vld [vmem:[#allocation5 + $0x5d0] sm:$0xff] }
 0x11c   :  { %2693 = vmatpush1.bf16.msra.mxu0 %v3076_v50  ;;  %2822 = vmatpush1.bf16.msra.mxu1 %v3078_v51  ;;  %v3143_v50 = vcombine.high %v203_v45, %v207_v46  ;;  %v210_v51 = vld [vmem:[#allocation5 + $0x450] sm:$0xff] }
 0x11d   :  { %2694 = vmatprep.subr.bf16.mxu0 %v3085_v52  ;;  %2823 = vmatprep.subr.bf16.mxu1 %v3087_v53  ;;  %v214_v52 = vld [vmem:[#allocation5 + $0x470] sm:$0xff]  ;;  %v211_v53 = vld [vmem:[#allocation5 + $0x458] sm:$0xff] }
 0x11e   :  { %v3149_v57 = vcombine.high %v210_v51, %v214_v52  ;;  %v3148_v0 = vcombine.low %v210_v51, %v214_v52  ;;  %v3150_v1 = vcombine.low %v211_v53, %v215_v54  ;;  %v266_v46 = vld [vmem:[#allocation5 + $0x610] sm:$0xff] }
 0x120   :  { %2695 = vmatpush1.bf16.msra.mxu0 %v3084_v59  ;;  %2824 = vmatpush1.bf16.msra.mxu1 %v3086_v60  ;;  %v3151_v59 = vcombine.high %v211_v53, %v215_v54  ;;  %v218_v60 = vld [vmem:[#allocation5 + $0x490] sm:$0xff] }
 0x121   :  { %2696 = vmatprep.subr.bf16.mxu0 %v3093_v61  ;;  %2825 = vmatprep.subr.bf16.mxu1 %v3095_v62  ;;  %v222_v61 = vld [vmem:[#allocation5 + $0x4b0] sm:$0xff]  ;;  %v219_v62 = vld [vmem:[#allocation5 + $0x498] sm:$0xff] }
 0x122   :  { %v3157_v2 = vcombine.high %v218_v60, %v222_v61  ;;  %v3156_v8 = vcombine.low %v218_v60, %v222_v61  ;;  %v274_v54 = vld [vmem:[#allocation5 + $0x650] sm:$0xff] }
 0x124   :  { %2697 = vmatpush1.bf16.msra.mxu0 %v3092_v3  ;;  %2826 = vmatpush1.bf16.msra.mxu1 %v3094_v4  ;;  %v3159_v3 = vcombine.high %v219_v62, %v223_v63  ;;  %v226_v4 = vld [vmem:[#allocation5 + $0x4d0] sm:$0xff] }
 0x125   :  { %2698 = vmatprep.subr.bf16.mxu0 %v3101_v5  ;;  %2827 = vmatprep.subr.bf16.mxu1 %v3103_v6  ;;  %v230_v5 = vld [vmem:[#allocation5 + $0x4f0] sm:$0xff]  ;;  %v227_v6 = vld [vmem:[#allocation5 + $0x4d8] sm:$0xff] }
 0x126   :  { %v3165_v58 = vcombine.high %v226_v4, %v230_v5  ;;  %v3167_v9 = vcombine.high %v227_v6, %v231_v7  ;;  %v3164_v14 = vcombine.low %v226_v4, %v230_v5  ;;  %v3166_v16 = vcombine.low %v227_v6, %v231_v7  ;;  %v290_v7 = vld [vmem:[#allocation5 + $0x6d0] sm:$0xff] }
 0x128   :  { %2699 = vmatpush1.bf16.msra.mxu0 %v3100_v10  ;;  %2828 = vmatpush1.bf16.msra.mxu1 %v3102_v11  ;;  %v234_v10 = vld [vmem:[#allocation5 + $0x510] sm:$0xff] }
 0x129   :  { %2700 = vmatprep.subr.bf16.mxu0 %v3109_v12  ;;  %2829 = vmatprep.subr.bf16.mxu1 %v3111_v13  ;;  %v238_v11 = vld [vmem:[#allocation5 + $0x530] sm:$0xff]  ;;  %v235_v12 = vld [vmem:[#allocation5 + $0x518] sm:$0xff] }
 0x12a   :  { %v239_v13 = vld [vmem:[#allocation5 + $0x538] sm:$0xff]  ;;  %v3173_v17 = vcombine.high %v234_v10, %v238_v11 }
 0x12b   :  { %v3174_v23 = vcombine.low %v235_v12, %v239_v13 }
 0x12c   :  { %2701 = vmatpush1.bf16.msra.mxu0 %v3108_v19  ;;  %2830 = vmatpush1.bf16.msra.mxu1 %v3110_v20  ;;  %v246_v19 = vld [vmem:[#allocation5 + $0x570] sm:$0xff]  ;;  %v243_v20 = vld [vmem:[#allocation5 + $0x558] sm:$0xff] }
 0x12d   :  { %2702 = vmatprep.subr.bf16.mxu0 %v3117_v21  ;;  %2831 = vmatprep.subr.bf16.mxu1 %v3119_v22  ;;  %v247_v21 = vld [vmem:[#allocation5 + $0x578] sm:$0xff]  ;;  %v3172_v22 = vcombine.low %v234_v10, %v238_v11  ;;  %v3181_v24 = vcombine.high %v242_v18, %v246_v19 }
 0x12e   :  { %v3183_v26 = vcombine.high %v243_v20, %v247_v21  ;;  %v3182_v33 = vcombine.low %v243_v20, %v247_v21  ;;  %v306_v21 = vld [vmem:[#allocation5 + $0x750] sm:$0xff] }
 0x130   :  { %2703 = vmatpush1.bf16.msra.mxu0 %v3116_v29  ;;  %2832 = vmatpush1.bf16.msra.mxu1 %v3118_v30  ;;  %v254_v29 = vld [vmem:[#allocation5 + $0x5b0] sm:$0xff]  ;;  %v251_v30 = vld [vmem:[#allocation5 + $0x598] sm:$0xff] }
 0x131   :  { %2704 = vmatprep.subr.bf16.mxu0 %v3125_v31  ;;  %2833 = vmatprep.subr.bf16.mxu1 %v3127_v32  ;;  %v255_v31 = vld [vmem:[#allocation5 + $0x5b8] sm:$0xff]  ;;  %v3180_v32 = vcombine.low %v242_v18, %v246_v19  ;;  %v3189_v34 = vcombine.high %v250_v28, %v254_v29 }
 0x132   :  { %v3191_v35 = vcombine.high %v251_v30, %v255_v31  ;;  %v3190_v43 = vcombine.low %v251_v30, %v255_v31  ;;  %v314_v31 = vld [vmem:[#allocation5 + $0x790] sm:$0xff] }
 0x134   :  { %2705 = vmatpush1.bf16.msra.mxu0 %v3124_v38  ;;  %2834 = vmatpush1.bf16.msra.mxu1 %v3126_v39  ;;  %v262_v38 = vld [vmem:[#allocation5 + $0x5f0] sm:$0xff]  ;;  %v259_v39 = vld [vmem:[#allocation5 + $0x5d8] sm:$0xff] }
 0x135   :  { %2706 = vmatprep.subr.bf16.mxu0 %v3133_v40  ;;  %2835 = vmatprep.subr.bf16.mxu1 %v3135_v41  ;;  %v263_v40 = vld [vmem:[#allocation5 + $0x5f8] sm:$0xff]  ;;  %v3188_v41 = vcombine.low %v250_v28, %v254_v29  ;;  %v3197_v44 = vcombine.high %v258_v36, %v262_v38 }
 0x136   :  { %v3199_v45 = vcombine.high %v259_v39, %v263_v40  ;;  %v3198_v51 = vcombine.low %v259_v39, %v263_v40  ;;  %v322_v40 = vld [vmem:[#allocation5 + $0x7d0] sm:$0xff] }
 0x138   :  { %2707 = vmatpush1.bf16.msra.mxu0 %v3132_v47  ;;  %2836 = vmatpush1.bf16.msra.mxu1 %v3134_v48  ;;  %v270_v47 = vld [vmem:[#allocation5 + $0x630] sm:$0xff]  ;;  %v267_v48 = vld [vmem:[#allocation5 + $0x618] sm:$0xff] }
 0x139   :  { %2719 = vmatprep.subr.bf16.mxu0 %v3141_v49  ;;  %2848 = vmatprep.subr.bf16.mxu1 %v3143_v50  ;;  %v271_v49 = vld [vmem:[#allocation5 + $0x638] sm:$0xff]  ;;  %v3196_v50 = vcombine.low %v258_v36, %v262_v38  ;;  %v3205_v52 = vcombine.high %v266_v46, %v270_v47 }
 0x13a   :  { %v3207_v53 = vcombine.high %v267_v48, %v271_v49  ;;  %v3206_v60 = vcombine.low %v267_v48, %v271_v49  ;;  %v330_v49 = vld [vmem:[#allocation5 + $0x810] sm:$0xff] }
 0x13b   :  { %2709 = vmatmul.mubr.bf16.vlgmr.msra.gmra.mrb[4].mxu0 %v3629_v15  ;;  %2838 = vmatmul.mubr.bf16.vlgmr.msra.gmra.mrb[4].mxu1 %v3629_v15  ;;  %v3158_v15 = vcombine.low %v219_v62, %v223_v63  ;;  %v282_v63 = vld [vmem:[#allocation5 + $0x690] sm:$0xff] }
 0x13c   :  { %2720 = vmatpush1.bf16.msra.mxu0 %v3140_v55  ;;  %2849 = vmatpush1.bf16.msra.mxu1 %v3142_v56  ;;  %v278_v55 = vld [vmem:[#allocation5 + $0x670] sm:$0xff]  ;;  %v275_v56 = vld [vmem:[#allocation5 + $0x658] sm:$0xff] }
 0x13d   :  { %2721 = vmatprep.subr.bf16.mxu0 %v3149_v57  ;;  %2850 = vmatprep.subr.bf16.mxu1 %v3151_v59  ;;  %v279_v57 = vld [vmem:[#allocation5 + $0x678] sm:$0xff]  ;;  %v3204_v59 = vcombine.low %v266_v46, %v270_v47  ;;  %v3213_v61 = vcombine.high %v274_v54, %v278_v55 }
 0x13e   :  { %2751 = vmatprep.mubr.bf16.mxu0 %v3631_v25  ;;  %2880 = vmatprep.mubr.bf16.mxu1 %v3631_v25  ;;  %v3175_v25 = vcombine.high %v235_v12, %v239_v13  ;;  %v3215_v62 = vcombine.high %v275_v56, %v279_v57  ;;  %v3214_v4 = vcombine.low %v275_v56, %v279_v57  ;;  %v298_v13 = vld [vmem:[#allocation5 + $0x710] sm:$0xff] }
 0x13f   :  { %v338_v57 = vld [vmem:[#allocation5 + $0x850] sm:$0xff] }
 0x140   :  { %2722 = vmatpush1.bf16.msra.mxu0 %v3148_v0  ;;  %2851 = vmatpush1.bf16.msra.mxu1 %v3150_v1  ;;  %v286_v0 = vld [vmem:[#allocation5 + $0x6b0] sm:$0xff]  ;;  %v283_v1 = vld [vmem:[#allocation5 + $0x698] sm:$0xff] }
 0x141   :  { %2723 = vmatprep.subr.bf16.mxu0 %v3157_v2  ;;  %2852 = vmatprep.subr.bf16.mxu1 %v3159_v3  ;;  %v287_v2 = vld [vmem:[#allocation5 + $0x6b8] sm:$0xff]  ;;  %v3212_v3 = vcombine.low %v274_v54, %v278_v55  ;;  %v3221_v5 = vcombine.high %v282_v63, %v286_v0 }
 0x142   :  { %v3223_v6 = vcombine.high %v283_v1, %v287_v2  ;;  %v3222_v10 = vcombine.low %v283_v1, %v287_v2  ;;  %v346_v2 = vld [vmem:[#allocation5 + $0x890] sm:$0xff] }
 0x144   :  { %2724 = vmatpush1.bf16.msra.mxu0 %v3156_v8  ;;  %2853 = vmatpush1.bf16.msra.mxu1 %v3158_v15  ;;  %v294_v8 = vld [vmem:[#allocation5 + $0x6f0] sm:$0xff]  ;;  %v291_v15 = vld [vmem:[#allocation5 + $0x6d8] sm:$0xff] }
 0x145   :  { %2725 = vmatprep.subr.bf16.mxu0 %v3165_v58  ;;  %2854 = vmatprep.subr.bf16.mxu1 %v3167_v9  ;;  %v295_v58 = vld [vmem:[#allocation5 + $0x6f8] sm:$0xff]  ;;  %v3220_v9 = vcombine.low %v282_v63, %v286_v0  ;;  %v3229_v11 = vcombine.high %v290_v7, %v294_v8 }
 0x146   :  { %v3231_v12 = vcombine.high %v291_v15, %v295_v58  ;;  %v3230_v18 = vcombine.low %v291_v15, %v295_v58  ;;  %v354_v58 = vld [vmem:[#allocation5 + $0x8d0] sm:$0xff] }
 0x148   :  { %2726 = vmatpush1.bf16.msra.mxu0 %v3164_v14  ;;  %2855 = vmatpush1.bf16.msra.mxu1 %v3166_v16  ;;  %v302_v14 = vld [vmem:[#allocation5 + $0x730] sm:$0xff]  ;;  %v299_v16 = vld [vmem:[#allocation5 + $0x718] sm:$0xff] }
 0x149   :  { %2727 = vmatprep.subr.bf16.mxu0 %v3173_v17  ;;  %2856 = vmatprep.subr.bf16.mxu1 %v3175_v25  ;;  %v303_v17 = vld [vmem:[#allocation5 + $0x738] sm:$0xff]  ;;  %v3228_v25 = vcombine.low %v290_v7, %v294_v8  ;;  %v3237_v19 = vcombine.high %v298_v13, %v302_v14 }
 0x14a   :  { %v3239_v20 = vcombine.high %v299_v16, %v303_v17  ;;  %v3238_v28 = vcombine.low %v299_v16, %v303_v17  ;;  %v362_v16 = vld [vmem:[#allocation5 + $0x910] sm:$0xff] }
 0x14b   :  { %v366_v17 = vld [vmem:[#allocation5 + $0x930] sm:$0xff] }
 0x14c   :  { %2728 = vmatpush1.bf16.msra.mxu0 %v3172_v22  ;;  %2857 = vmatpush1.bf16.msra.mxu1 %v3174_v23  ;;  %v310_v22 = vld [vmem:[#allocation5 + $0x770] sm:$0xff]  ;;  %v307_v23 = vld [vmem:[#allocation5 + $0x758] sm:$0xff] }
 0x14d   :  { %2729 = vmatprep.subr.bf16.mxu0 %v3181_v24  ;;  %2858 = vmatprep.subr.bf16.mxu1 %v3183_v26  ;;  %v311_v24 = vld [vmem:[#allocation5 + $0x778] sm:$0xff]  ;;  %v3236_v26 = vcombine.low %v298_v13, %v302_v14  ;;  %v3245_v29 = vcombine.high %v306_v21, %v310_v22 }
 0x14e   :  { %v3247_v30 = vcombine.high %v307_v23, %v311_v24  ;;  %v3246_v36 = vcombine.low %v307_v23, %v311_v24  ;;  %v374_v23 = vld [vmem:[#allocation5 + $0x970] sm:$0xff]  ;;  %v371_v24 = vld [vmem:[#allocation5 + $0x958] sm:$0xff] }
 0x150   :  { %2730 = vmatpush1.bf16.msra.mxu0 %v3180_v32  ;;  %2859 = vmatpush1.bf16.msra.mxu1 %v3182_v33  ;;  %v318_v32 = vld [vmem:[#allocation5 + $0x7b0] sm:$0xff]  ;;  %v315_v33 = vld [vmem:[#allocation5 + $0x798] sm:$0xff] }
 0x151   :  { %2731 = vmatprep.subr.bf16.mxu0 %v3189_v34  ;;  %2860 = vmatprep.subr.bf16.mxu1 %v3191_v35  ;;  %v319_v34 = vld [vmem:[#allocation5 + $0x7b8] sm:$0xff]  ;;  %v3244_v35 = vcombine.low %v306_v21, %v310_v22  ;;  %v3253_v38 = vcombine.high %v314_v31, %v318_v32  ;;  %v3301_v21 = vcombine.high %v362_v16, %v366_v17  ;;  %v370_v22 = vld [vmem:[#allocation5 + $0x950] sm:$0xff] }
 0x152   :  { %v3255_v39 = vcombine.high %v315_v33, %v319_v34  ;;  %v3254_v46 = vcombine.low %v315_v33, %v319_v34  ;;  %v382_v33 = vld [vmem:[#allocation5 + $0x9b0] sm:$0xff]  ;;  %v379_v34 = vld [vmem:[#allocation5 + $0x998] sm:$0xff] }
 0x154   :  { %2732 = vmatpush1.bf16.msra.mxu0 %v3188_v41  ;;  %2861 = vmatpush1.bf16.msra.mxu1 %v3190_v43  ;;  %v326_v41 = vld [vmem:[#allocation5 + $0x7f0] sm:$0xff]  ;;  %v323_v43 = vld [vmem:[#allocation5 + $0x7d8] sm:$0xff] }
 0x155   :  { %2733 = vmatprep.subr.bf16.mxu0 %v3197_v44  ;;  %2862 = vmatprep.subr.bf16.mxu1 %v3199_v45  ;;  %v327_v44 = vld [vmem:[#allocation5 + $0x7f8] sm:$0xff]  ;;  %v3252_v45 = vcombine.low %v314_v31, %v318_v32  ;;  %v3261_v47 = vcombine.high %v322_v40, %v326_v41  ;;  %v378_v32 = vld [vmem:[#allocation5 + $0x990] sm:$0xff] }
 0x156   :  { %v3263_v48 = vcombine.high %v323_v43, %v327_v44  ;;  %v3262_v54 = vcombine.low %v323_v43, %v327_v44  ;;  %v390_v43 = vld [vmem:[#allocation5 + $0x9f0] sm:$0xff]  ;;  %v387_v44 = vld [vmem:[#allocation5 + $0x9d8] sm:$0xff] }
 0x158   :  { %2734 = vmatpush1.bf16.msra.mxu0 %v3196_v50  ;;  %2863 = vmatpush1.bf16.msra.mxu1 %v3198_v51  ;;  %v334_v50 = vld [vmem:[#allocation5 + $0x830] sm:$0xff]  ;;  %v331_v51 = vld [vmem:[#allocation5 + $0x818] sm:$0xff] }
 0x159   :  { %2735 = vmatprep.subr.bf16.mxu0 %v3205_v52  ;;  %2864 = vmatprep.subr.bf16.mxu1 %v3207_v53  ;;  %v335_v52 = vld [vmem:[#allocation5 + $0x838] sm:$0xff]  ;;  %v3260_v53 = vcombine.low %v322_v40, %v326_v41  ;;  %v3269_v55 = vcombine.high %v330_v49, %v334_v50  ;;  %v386_v41 = vld [vmem:[#allocation5 + $0x9d0] sm:$0xff] }
 0x15a   :  { %v3271_v56 = vcombine.high %v331_v51, %v335_v52  ;;  %v3270_v63 = vcombine.low %v331_v51, %v335_v52  ;;  %v398_v51 = vld [vmem:[#allocation5 + $0xa30] sm:$0xff]  ;;  %v395_v52 = vld [vmem:[#allocation5 + $0xa18] sm:$0xff] }
 0x15c   :  { %2736 = vmatpush1.bf16.msra.mxu0 %v3204_v59  ;;  %2865 = vmatpush1.bf16.msra.mxu1 %v3206_v60  ;;  %v342_v59 = vld [vmem:[#allocation5 + $0x870] sm:$0xff]  ;;  %v339_v60 = vld [vmem:[#allocation5 + $0x858] sm:$0xff] }
 0x15d   :  { %2737 = vmatprep.subr.bf16.mxu0 %v3213_v61  ;;  %2866 = vmatprep.subr.bf16.mxu1 %v3215_v62  ;;  %v343_v61 = vld [vmem:[#allocation5 + $0x878] sm:$0xff]  ;;  %v3268_v62 = vcombine.low %v330_v49, %v334_v50  ;;  %v3277_v0 = vcombine.high %v338_v57, %v342_v59  ;;  %v394_v50 = vld [vmem:[#allocation5 + $0xa10] sm:$0xff] }
 0x15e   :  { %v3279_v1 = vcombine.high %v339_v60, %v343_v61  ;;  %v3278_v7 = vcombine.low %v339_v60, %v343_v61  ;;  %v406_v60 = vld [vmem:[#allocation5 + $0xa70] sm:$0xff]  ;;  %v403_v61 = vld [vmem:[#allocation5 + $0xa58] sm:$0xff] }
 0x160   :  { %2738 = vmatpush1.bf16.msra.mxu0 %v3212_v3  ;;  %2867 = vmatpush1.bf16.msra.mxu1 %v3214_v4  ;;  %v350_v3 = vld [vmem:[#allocation5 + $0x8b0] sm:$0xff]  ;;  %v347_v4 = vld [vmem:[#allocation5 + $0x898] sm:$0xff] }
 0x161   :  { %2739 = vmatprep.subr.bf16.mxu0 %v3221_v5  ;;  %2868 = vmatprep.subr.bf16.mxu1 %v3223_v6  ;;  %v351_v5 = vld [vmem:[#allocation5 + $0x8b8] sm:$0xff]  ;;  %v3276_v6 = vcombine.low %v338_v57, %v342_v59  ;;  %v3285_v8 = vcombine.high %v346_v2, %v350_v3  ;;  %v402_v59 = vld [vmem:[#allocation5 + $0xa50] sm:$0xff] }
 0x162   :  { %v3287_v15 = vcombine.high %v347_v4, %v351_v5 }
 0x164   :  { %2740 = vmatpush1.bf16.msra.mxu0 %v3220_v9  ;;  %2869 = vmatpush1.bf16.msra.mxu1 %v3222_v10  ;;  %v358_v9 = vld [vmem:[#allocation5 + $0x8f0] sm:$0xff]  ;;  %v355_v10 = vld [vmem:[#allocation5 + $0x8d8] sm:$0xff] }
 0x165   :  { %2741 = vmatprep.subr.bf16.mxu0 %v3229_v11  ;;  %2870 = vmatprep.subr.bf16.mxu1 %v3231_v12  ;;  %v359_v11 = vld [vmem:[#allocation5 + $0x8f8] sm:$0xff]  ;;  %v3284_v12 = vcombine.low %v346_v2, %v350_v3  ;;  %v3293_v13 = vcombine.high %v354_v58, %v358_v9  ;;  %v410_v3 = vld [vmem:[#allocation5 + $0xa90] sm:$0xff] }
 0x166   :  { %v3295_v14 = vcombine.high %v355_v10, %v359_v11 }
 0x168   :  { %2742 = vmatpush1.bf16.msra.mxu0 %v3228_v25  ;;  %2871 = vmatpush1.bf16.msra.mxu1 %v3230_v18  ;;  %v363_v25 = vld [vmem:[#allocation5 + $0x918] sm:$0xff] }
 0x169   :  { %2743 = vmatprep.subr.bf16.mxu0 %v3237_v19  ;;  %2872 = vmatprep.subr.bf16.mxu1 %v3239_v20  ;;  %v367_v18 = vld [vmem:[#allocation5 + $0x938] sm:$0xff]  ;;  %v3292_v19 = vcombine.low %v354_v58, %v358_v9  ;;  %v3294_v20 = vcombine.low %v355_v10, %v359_v11  ;;  %v418_v9 = vld [vmem:[#allocation5 + $0xad0] sm:$0xff] }
 0x16a   :  { %v422_v10 = vld [vmem:[#allocation5 + $0xaf0] sm:$0xff]  ;;  %v419_v11 = vld [vmem:[#allocation5 + $0xad8] sm:$0xff] }
 0x16c   :  { %2744 = vmatpush1.bf16.msra.mxu0 %v3236_v26  ;;  %2873 = vmatpush1.bf16.msra.mxu1 %v3238_v28  ;;  %v375_v26 = vld [vmem:[#allocation5 + $0x978] sm:$0xff]  ;;  %v3300_v28 = vcombine.low %v362_v16, %v366_v17  ;;  %v426_v17 = vld [vmem:[#allocation5 + $0xb10] sm:$0xff] }
 0x16d   :  { %2745 = vmatprep.subr.bf16.mxu0 %v3245_v29  ;;  %2874 = vmatprep.subr.bf16.mxu1 %v3247_v30  ;;  %v3302_v29 = vcombine.low %v363_v25, %v367_v18  ;;  %v3309_v30 = vcombine.high %v370_v22, %v374_v23  ;;  %v3311_v31 = vcombine.high %v371_v24, %v375_v26 }
 0x170   :  { %2746 = vmatpush1.bf16.msra.mxu0 %v3244_v35  ;;  %2875 = vmatpush1.bf16.msra.mxu1 %v3246_v36  ;;  %v383_v35 = vld [vmem:[#allocation5 + $0x9b8] sm:$0xff]  ;;  %v3308_v36 = vcombine.low %v370_v22, %v374_v23  ;;  %v434_v23 = vld [vmem:[#allocation5 + $0xb50] sm:$0xff] }
 0x171   :  { %2747 = vmatprep.subr.bf16.mxu0 %v3253_v38  ;;  %2876 = vmatprep.subr.bf16.mxu1 %v3255_v39  ;;  %v3310_v38 = vcombine.low %v371_v24, %v375_v26  ;;  %v3317_v39 = vcombine.high %v378_v32, %v382_v33  ;;  %v3319_v40 = vcombine.high %v379_v34, %v383_v35  ;;  %v438_v24 = vld [vmem:[#allocation5 + $0xb70] sm:$0xff]  ;;  %v435_v26 = vld [vmem:[#allocation5 + $0xb58] sm:$0xff] }
 0x174   :  { %2748 = vmatpush1.bf16.msra.mxu0 %v3252_v45  ;;  %2877 = vmatpush1.bf16.msra.mxu1 %v3254_v46  ;;  %v391_v45 = vld [vmem:[#allocation5 + $0x9f8] sm:$0xff]  ;;  %v3316_v46 = vcombine.low %v378_v32, %v382_v33  ;;  %v442_v33 = vld [vmem:[#allocation5 + $0xb90] sm:$0xff] }
 0x175   :  { %2749 = vmatprep.subr.bf16.mxu0 %v3261_v47  ;;  %2878 = vmatprep.subr.bf16.mxu1 %v3263_v48  ;;  %v3318_v47 = vcombine.low %v379_v34, %v383_v35  ;;  %v3325_v48 = vcombine.high %v386_v41, %v390_v43  ;;  %v3327_v49 = vcombine.high %v387_v44, %v391_v45  ;;  %v446_v34 = vld [vmem:[#allocation5 + $0xbb0] sm:$0xff]  ;;  %v443_v35 = vld [vmem:[#allocation5 + $0xb98] sm:$0xff] }
 0x178   :  { %2750 = vmatpush1.bf16.msra.mxu0 %v3260_v53  ;;  %2879 = vmatpush1.bf16.msra.mxu1 %v3262_v54  ;;  %v399_v53 = vld [vmem:[#allocation5 + $0xa38] sm:$0xff]  ;;  %v3324_v54 = vcombine.low %v386_v41, %v390_v43  ;;  %v450_v43 = vld [vmem:[#allocation5 + $0xbd0] sm:$0xff] }
 0x179   :  { %2762 = vmatprep.subr.bf16.mxu0 %v3269_v55  ;;  %2891 = vmatprep.subr.bf16.mxu1 %v3271_v56  ;;  %v3326_v55 = vcombine.low %v387_v44, %v391_v45  ;;  %v3333_v56 = vcombine.high %v394_v50, %v398_v51  ;;  %v3335_v57 = vcombine.high %v395_v52, %v399_v53  ;;  %v454_v44 = vld [vmem:[#allocation5 + $0xbf0] sm:$0xff]  ;;  %v451_v45 = vld [vmem:[#allocation5 + $0xbd8] sm:$0xff] }
 0x17b   :  { %2752 = vmatmul.mubr.bf16.vlgmr.msra.gmra.mrb[4].mxu0 %v3637_v27  ;;  %2881 = vmatmul.mubr.bf16.vlgmr.msra.gmra.mrb[4].mxu1 %v3637_v27  ;;  %v3286_v27 = vcombine.low %v347_v4, %v351_v5  ;;  %v414_v4 = vld [vmem:[#allocation5 + $0xab0] sm:$0xff]  ;;  %v411_v5 = vld [vmem:[#allocation5 + $0xa98] sm:$0xff] }
 0x17c   :  { %2763 = vmatpush1.bf16.msra.mxu0 %v3268_v62  ;;  %2892 = vmatpush1.bf16.msra.mxu1 %v3270_v63  ;;  %v407_v62 = vld [vmem:[#allocation5 + $0xa78] sm:$0xff]  ;;  %v3332_v63 = vcombine.low %v394_v50, %v398_v51  ;;  %v3388_v51 = vcombine.low %v450_v43, %v454_v44 }
 0x17d   :  { %2764 = vmatprep.subr.bf16.mxu0 %v3277_v0  ;;  %2893 = vmatprep.subr.bf16.mxu1 %v3279_v1  ;;  %v3334_v0 = vcombine.low %v395_v52, %v399_v53  ;;  %v3341_v1 = vcombine.high %v402_v59, %v406_v60  ;;  %v3343_v2 = vcombine.high %v403_v61, %v407_v62  ;;  %v458_v53 = vlaneseq }
 0x17e   :  { %2794 = vmatprep.mubr.bf16.mxu0 %v3639_v37  ;;  %2923 = vmatprep.mubr.bf16.mxu1 %v3639_v37  ;;  %v3303_v37 = vcombine.high %v363_v25, %v367_v18  ;;  %v430_v25 = vld [vmem:[#allocation5 + $0xb30] sm:$0xff]  ;;  %v427_v18 = vld [vmem:[#allocation5 + $0xb18] sm:$0xff] }
 0x180   :  { %2765 = vmatpush1.bf16.msra.mxu0 %v3276_v6  ;;  %2894 = vmatpush1.bf16.msra.mxu1 %v3278_v7  ;;  %v415_v6 = vld [vmem:[#allocation5 + $0xab8] sm:$0xff]  ;;  %v3340_v7 = vcombine.low %v402_v59, %v406_v60 }
 0x181   :  { %2766 = vmatprep.subr.bf16.mxu0 %v3285_v8  ;;  %2895 = vmatprep.subr.bf16.mxu1 %v3287_v15  ;;  %v3342_v8 = vcombine.low %v403_v61, %v407_v62  ;;  %v3349_v15 = vcombine.high %v410_v3, %v414_v4  ;;  %v3351_v58 = vcombine.high %v411_v5, %v415_v6 }
 0x184   :  { %2767 = vmatpush1.bf16.msra.mxu0 %v3284_v12  ;;  %2896 = vmatpush1.bf16.msra.mxu1 %v3286_v27  ;;  %v423_v12 = vld [vmem:[#allocation5 + $0xaf8] sm:$0xff]  ;;  %v3348_v27 = vcombine.low %v410_v3, %v414_v4 }
 0x185   :  { %2768 = vmatprep.subr.bf16.mxu0 %v3293_v13  ;;  %2897 = vmatprep.subr.bf16.mxu1 %v3295_v14  ;;  %v3350_v13 = vcombine.low %v411_v5, %v415_v6  ;;  %v3357_v14 = vcombine.high %v418_v9, %v422_v10  ;;  %v3359_v16 = vcombine.high %v419_v11, %v423_v12 }
 0x188   :  { %2769 = vmatpush1.bf16.msra.mxu0 %v3292_v19  ;;  %2898 = vmatpush1.bf16.msra.mxu1 %v3294_v20  ;;  %v431_v19 = vld [vmem:[#allocation5 + $0xb38] sm:$0xff]  ;;  %v3356_v20 = vcombine.low %v418_v9, %v422_v10 }
 0x189   :  { %2770 = vmatprep.subr.bf16.mxu0 %v3301_v21  ;;  %2899 = vmatprep.subr.bf16.mxu1 %v3303_v37  ;;  %v3358_v21 = vcombine.low %v419_v11, %v423_v12  ;;  %v3365_v37 = vcombine.high %v426_v17, %v430_v25  ;;  %v3367_v22 = vcombine.high %v427_v18, %v431_v19 }
 0x18c   :  { %2771 = vmatpush1.bf16.msra.mxu0 %v3300_v28  ;;  %2900 = vmatpush1.bf16.msra.mxu1 %v3302_v29  ;;  %v439_v28 = vld [vmem:[#allocation5 + $0xb78] sm:$0xff]  ;;  %v3364_v29 = vcombine.low %v426_v17, %v430_v25 }
 0x18d   :  { %2772 = vmatprep.subr.bf16.mxu0 %v3309_v30  ;;  %2901 = vmatprep.subr.bf16.mxu1 %v3311_v31  ;;  %v3366_v30 = vcombine.low %v427_v18, %v431_v19  ;;  %v3373_v31 = vcombine.high %v434_v23, %v438_v24  ;;  %v3375_v32 = vcombine.high %v435_v26, %v439_v28 }
 0x190   :  { %2773 = vmatpush1.bf16.msra.mxu0 %v3308_v36  ;;  %2902 = vmatpush1.bf16.msra.mxu1 %v3310_v38  ;;  %v447_v36 = vld [vmem:[#allocation5 + $0xbb8] sm:$0xff]  ;;  %v3372_v38 = vcombine.low %v434_v23, %v438_v24 }
 0x191   :  { %2774 = vmatprep.subr.bf16.mxu0 %v3317_v39  ;;  %2903 = vmatprep.subr.bf16.mxu1 %v3319_v40  ;;  %v3374_v39 = vcombine.low %v435_v26, %v439_v28  ;;  %v3381_v40 = vcombine.high %v442_v33, %v446_v34  ;;  %v3383_v41 = vcombine.high %v443_v35, %v447_v36 }
 0x194   :  { %2775 = vmatpush1.bf16.msra.mxu0 %v3316_v46  ;;  %2904 = vmatpush1.bf16.msra.mxu1 %v3318_v47  ;;  %v455_v46 = vld [vmem:[#allocation5 + $0xbf8] sm:$0xff]  ;;  %v3380_v47 = vcombine.low %v442_v33, %v446_v34 }
 0x195   :  { %2776 = vmatprep.subr.bf16.mxu0 %v3325_v48  ;;  %2905 = vmatprep.subr.bf16.mxu1 %v3327_v49  ;;  %v3382_v48 = vcombine.low %v443_v35, %v447_v36  ;;  %v3389_v49 = vcombine.high %v450_v43, %v454_v44  ;;  %v3391_v50 = vcombine.high %v451_v45, %v455_v46 }
 0x196   :  { %v3390_v52 = vcombine.low %v451_v45, %v455_v46 }
 0x198   :  { %2777 = vmatpush1.bf16.msra.mxu0 %v3324_v54  ;;  %2906 = vmatpush1.bf16.msra.mxu1 %v3326_v55  ;;  %v459_v54 = vshrl.u32 %v458_v53, 7 }
 0x199   :  { %2778 = vmatprep.subr.bf16.mxu0 %v3333_v56  ;;  %2907 = vmatprep.subr.bf16.mxu1 %v3335_v57  ;;  %v456_v56 = vld [vmem:[#allocation7] sm:$0xff] }
 0x19a   :  { %v460_v55 = vsub.s32 0, %v459_v54  ;;  %v468_v57 = vsub.s32 2, %v459_v54  ;;  %v464_v59 = vsub.s32 1, %v459_v54  ;;  %v472_v60 = vsub.s32 3, %v459_v54 }
 0x19b   :  { %v476_v25 = vsub.s32 4, %v459_v54  ;;  %v484_v18 = vsub.s32 6, %v459_v54  ;;  %v480_v19 = vsub.s32 5, %v459_v54 }
 0x19c   :  { %2779 = vmatpush1.bf16.msra.mxu0 %v3332_v63  ;;  %2908 = vmatpush1.bf16.msra.mxu1 %v3334_v0  ;;  %v461_v61 = vrot.slane %v456_v56, %v460_v55  ;;  %v469_v62 = vrot.slane %v456_v56, %v468_v57  ;;  %v465_v63 = vrot.slane %v456_v56, %v464_v59 }
 0x19d   :  { %2780 = vmatprep.subr.bf16.mxu0 %v3341_v1  ;;  %2909 = vmatprep.subr.bf16.mxu1 %v3343_v2  ;;  %v473_v0 = vrot.slane %v456_v56, %v472_v60 }
 0x1a0   :  { %2781 = vmatpush1.bf16.msra.mxu0 %v3340_v7  ;;  %2910 = vmatpush1.bf16.msra.mxu1 %v3342_v8 }
 0x1a1   :  { %2782 = vmatprep.subr.bf16.mxu0 %v3349_v15  ;;  %2911 = vmatprep.subr.bf16.mxu1 %v3351_v58 }
 0x1a4   :  { %2783 = vmatpush1.bf16.msra.mxu0 %v3348_v27  ;;  %2912 = vmatpush1.bf16.msra.mxu1 %v3350_v13 }
 0x1a5   :  { %2784 = vmatprep.subr.bf16.mxu0 %v3357_v14  ;;  %2913 = vmatprep.subr.bf16.mxu1 %v3359_v16 }
 0x1a8   :  { %2785 = vmatpush1.bf16.msra.mxu0 %v3356_v20  ;;  %2914 = vmatpush1.bf16.msra.mxu1 %v3358_v21  ;;  %v488_v20 = vsub.s32 7, %v459_v54  ;;  %v477_v21 = vrot.slane %v456_v56, %v476_v25 }
 0x1a9   :  { %2786 = vmatprep.subr.bf16.mxu0 %v3365_v37  ;;  %2915 = vmatprep.subr.bf16.mxu1 %v3367_v22  ;;  %v485_v37 = vrot.slane %v456_v56, %v484_v18  ;;  %v481_v22 = vrot.slane %v456_v56, %v480_v19 }
 0x1aa   :  { %v489_v23 = vrot.slane %v456_v56, %v488_v20 }
 0x1ac   :  { %2787 = vmatpush1.bf16.msra.mxu0 %v3364_v29  ;;  %2916 = vmatpush1.bf16.msra.mxu1 %v3366_v30 }
 0x1ad   :  { %2788 = vmatprep.subr.bf16.mxu0 %v3373_v31  ;;  %2917 = vmatprep.subr.bf16.mxu1 %v3375_v32 }
 0x1b0   :  { %2789 = vmatpush1.bf16.msra.mxu0 %v3372_v38  ;;  %2918 = vmatpush1.bf16.msra.mxu1 %v3374_v39 }
 0x1b1   :  { %2790 = vmatprep.subr.bf16.mxu0 %v3381_v40  ;;  %2919 = vmatprep.subr.bf16.mxu1 %v3383_v41 }
 0x1b4   :  { %2791 = vmatpush1.bf16.msra.mxu0 %v3380_v47  ;;  %2920 = vmatpush1.bf16.msra.mxu1 %v3382_v48 }
 0x1b5   :  { %2792 = vmatprep.subr.bf16.mxu0 %v3389_v49  ;;  %2921 = vmatprep.subr.bf16.mxu1 %v3391_v50 }
 0x1b8   :  { %2793 = vmatpush1.bf16.msra.mxu0 %v3388_v51  ;;  %2922 = vmatpush1.bf16.msra.mxu1 %v3390_v52 }
 0x1bb   :  { %2795 = vmatmul.mubr.bf16.vlgmr.msra.gmra.mrb[4].mxu0 %v3645_v42  ;;  %2924 = vmatmul.mubr.bf16.vlgmr.msra.gmra.mrb[4].mxu1 %v3645_v42 }
 0x1ce   :  { %v2538_v1 = vpop.f32.mrb[0].mxu0  ;;  %v2667_v3 = vpop.f32.mrb[0].mxu1 }
 0x1cf   :  { %v3408_v2 = vadd.f32 %v2538_v1, %v461_v61  ;;  %v2540_v4 = vpop.f32.mrb[1].mxu0  ;;  %v3412_v5 = vadd.f32 %v2667_v3, %v469_v62  ;;  %v2669_v7 = vpop.f32.mrb[1].mxu1 }
 0x1d0   :  { %v3409_v6 = vadd.f32 %v2540_v4, %v465_v63  ;;  %v2542_v8 = vpop.f32.mrb[2].mxu0  ;;  %v3413_v42 = vadd.f32 %v2669_v7, %v473_v0  ;;  %v2671_v58 = vpop.f32.mrb[2].mxu1 }
 0x1d1   :  { %v3410_v15 = vadd.f32 %v2542_v8, %v461_v61  ;;  %v2544_v9 = vpop.f32.mrb[3].mxu0  ;;  %v3414_v11 = vadd.f32 %v2671_v58, %v469_v62  ;;  %v2673_v27 = vpop.f32.mrb[3].mxu1 }
 0x1d2   :  { %v3400_v10 = vpack.c.bf16 %v3409_v6, %v3408_v2  ;;  %v3411_v12 = vadd.f32 %v2544_v9, %v465_v63  ;;  %v3401_v13 = vpack.c.bf16 %v3413_v42, %v3412_v5  ;;  %v3415_v14 = vadd.f32 %v2673_v27, %v473_v0 }
 0x1d4   :  { %2982 = vst [vmem:[#allocation8] sm:$0xff] %v3400_v10  ;;  %v3404_v16 = vpack.c.bf16 %v3411_v12, %v3410_v15  ;;  %2983 = vst [vmem:[#allocation8 + $0x8] sm:$0xff] %v3401_v13  ;;  %v3405_v17 = vpack.c.bf16 %v3415_v14, %v3414_v11 }
 0x1d6   :  { %2986 = vst [vmem:[#allocation8 + $0x20] sm:$0xff] %v3404_v16  ;;  %2987 = vst [vmem:[#allocation8 + $0x28] sm:$0xff] %v3405_v17 }
 0x28e   :  { %v2796_v24 = vpop.f32.mrb[4].mxu0  ;;  %v2925_v28 = vpop.f32.mrb[4].mxu1 }
 0x28f   :  { %v3416_v26 = vadd.f32 %v2796_v24, %v477_v21  ;;  %v2798_v29 = vpop.f32.mrb[5].mxu0  ;;  %v3420_v30 = vadd.f32 %v2925_v28, %v485_v37  ;;  %v2927_v32 = vpop.f32.mrb[5].mxu1 }
 0x290   :  { %v3417_v31 = vadd.f32 %v2798_v29, %v481_v22  ;;  %v2800_v33 = vpop.f32.mrb[6].mxu0  ;;  %v3421_v34 = vadd.f32 %v2927_v32, %v489_v23  ;;  %v2929_v36 = vpop.f32.mrb[6].mxu1 }
 0x291   :  { %v3418_v35 = vadd.f32 %v2800_v33, %v477_v21  ;;  %v2802_v38 = vpop.f32.mrb[7].mxu0  ;;  %v3422_v40 = vadd.f32 %v2929_v36, %v485_v37  ;;  %v2931_v43 = vpop.f32.mrb[7].mxu1 }
 0x292   :  { %v3402_v39 = vpack.c.bf16 %v3417_v31, %v3416_v26  ;;  %v3419_v41 = vadd.f32 %v2802_v38, %v481_v22  ;;  %v3403_v44 = vpack.c.bf16 %v3421_v34, %v3420_v30  ;;  %v3423_v45 = vadd.f32 %v2931_v43, %v489_v23 }
 0x294   :  { %2984 = vst [vmem:[#allocation8 + $0x10] sm:$0xff] %v3402_v39  ;;  %v3406_v46 = vpack.c.bf16 %v3419_v41, %v3418_v35  ;;  %2985 = vst [vmem:[#allocation8 + $0x18] sm:$0xff] %v3403_v44  ;;  %v3407_v47 = vpack.c.bf16 %v3423_v45, %v3422_v40 }
 0x296   :  { %2988 = vst [vmem:[#allocation8 + $0x30] sm:$0xff] %v3406_v46  ;;  %2989 = vst [vmem:[#allocation8 + $0x38] sm:$0xff] %v3407_v47 }
 0x297   :  { %3541 = shalt.err (!%p3538_p0)
}
 0x298   :  { %s3542_s29 = scalar_lea.hbm %s3679_s3, 1024 }
 0x299   :  { %p3543_p1 = scmp.ne.s32.totalorder %s3679_s3, %s3542_s29  ;;  %p3546_p2 = scmp.lt.u32.totalorder %s3542_s29, %s3679_s3 }
 0x29b   :  { %p3548_p3 = pnand %p3546_p2, %p3543_p1 }
 0x29d   :  { %3551 = shalt.err (!%p3548_p3)
}
 0x29e   :  { %3001 = dma.vmem_to_hbm [thread:$0]  %s2996_s25, 1024, %s3679_s3, [#allocation4], %s3559_s22, %s3559_s22, %s3560_s23  }
 0x29f   :  { %3556 = dma.done.wait [#allocation4], 1024  }
 0x2a0   :  { %3557 = vsyncadd [#allocation4], 4294966272 }
 0x2a1   :  { %3005 = vsyncpa [#allocation3], 1 }
 0x2a2   :  { %3006 = vsyncpa [#allocation6], 1 }
 0x2a3   :  { %3007 = vsyncpa [#allocation4], 1 }

</bundles_post_ra>
